<compile_context>
chip_gen: v7x
topology: tpu7x:2x2x1
jax: 0.10.0
libtpu: 0.0.40
codegen_flags: <defaults>
</compile_context>

<pallas_src>
import jax
import jax.numpy as jnp
from jax.experimental import pallas as pl
from jax.experimental.pallas import tpu as pltpu

EPS = 1e-5
LANE = 128


def _make_kernel(H, NB):
    """Build the fused kernel for NB whole halo-padded images per grid step."""
    RPI = H + 4              # padded rows per image (2-row zero halo each side)
    T = NB * RPI             # input rows per grid step
    M1 = T - 2               # conv1 matmul rows (h1 centered at padded rows 1..T-2)
    M2 = T - 4               # conv2 matmul rows

    def kernel(xp_ref, w1_ref, w2_ref, bn_ref, out_ref):
        # xp_ref : (T, 128) f32      NB halo-padded images, lanes = W*C -> 128
        # w*_ref : (3, 128, 128) bf16  banded conv weights, one tap per H offset
        # bn_ref : (4, 128) f32      rows = [s1, b1, s2, b2] (folded BatchNorm)
        # out_ref: (NB*H, 128) f32   compact, lane-dense output rows
        s1 = bn_ref[0:1, :]
        b1 = bn_ref[1:2, :]
        s2 = bn_ref[2:3, :]
        b2 = bn_ref[3:4, :]

        # ---- conv1: three accumulating MXU dots (bf16 operands, f32 acc).
        # h1[i] = conv1 output centered at padded row i+1.
        x0 = xp_ref[pl.ds(0, M1), :]
        x1 = xp_ref[pl.ds(1, M1), :]
        x2 = xp_ref[pl.ds(2, M1), :]          # dh=2 tap; also the residual source
        h1 = jnp.dot(x0.astype(jnp.bfloat16), w1_ref[0],
                     preferred_element_type=jnp.float32)
        h1 = h1 + jnp.dot(x1.astype(jnp.bfloat16), w1_ref[1],
                          preferred_element_type=jnp.float32)
        h1 = h1 + jnp.dot(x2.astype(jnp.bfloat16), w1_ref[2],
                          preferred_element_type=jnp.float32)

        # ---- bn1 (folded scale/shift) + relu1, f32 ----
        h1 = jnp.maximum(h1 * s1 + b1, 0.0)

        # ---- conv2 'same' zero padding along H: h1 rows sitting at image rows
        # -1 / H of each image chunk (chunk-local rows 0 / H+1) must be zero.
        rows = jax.lax.broadcasted_iota(jnp.int32, (M1, 1), 0)
        bad = (rows == 0) | (rows == H + 1)
        for nb in range(1, NB):
            bad = bad | (rows == nb * RPI) | (rows == nb * RPI + H + 1)
        keep = jnp.where(bad, 0.0, 1.0)       # (M1, 1) f32 row multiplier
        h1 = h1 * keep
        h1b = h1.astype(jnp.bfloat16)

        # ---- conv2: three accumulating MXU dots.
        # y[i] = conv2 output at image row (i mod RPI) of image chunk (i // RPI).
        y = jnp.dot(h1b[0:M2], w2_ref[0], preferred_element_type=jnp.float32)
        y = y + jnp.dot(h1b[1:M2 + 1], w2_ref[1],
                        preferred_element_type=jnp.float32)
        y = y + jnp.dot(h1b[2:M2 + 2], w2_ref[2],
                        preferred_element_type=jnp.float32)

        # ---- bn2 (folded) + residual (reuse dh=2 tap rows) + fix_relu ----
        y = jnp.maximum(y * s2 + b2 + x2[0:M2], 0.0)

        # ---- scatter the H valid rows of each image chunk to the compact
        # output block (fully written, lane-dense stores).
        for nb in range(NB):
            out_ref[pl.ds(nb * H, H), :] = y[nb * RPI:nb * RPI + H]

    return kernel


def _fold_bn(gamma, beta, mean, var):
    scale = gamma / jnp.sqrt(var + EPS)
    shift = beta - mean * scale
    return scale, shift


def _banded_conv_taps(w_hwio, W, lp):
    """Fold a (3,3,Cin,Cout) conv kernel into 3 banded (lp, lp) matrices (one
    per H tap) so a 'same'-padded 3x3 conv of row slabs (rows, W*Cin) becomes
    three accumulating matmuls over H-shifted row windows.  The W-direction
    taps and W-boundary zero padding live inside the banded matrices."""
    KH, KW, Cin, Cout = w_hwio.shape
    wi = jnp.arange(W)[:, None]          # input pixel column
    wo = jnp.arange(W)[None, :]          # output pixel column
    dw = wi - wo + (KW // 2)
    valid = (dw >= 0) & (dw < KW)
    dwc = jnp.clip(dw, 0, KW - 1)
    m = w_hwio[:, dwc, :, :]                              # (KH, Wi, Wo, Ci, Co)
    m = jnp.where(valid[None, :, :, None, None], m, 0.0)
    m = jnp.transpose(m, (0, 1, 3, 2, 4))                 # (KH, Wi, Ci, Wo, Co)
    m = m.reshape(KH, W * Cin, W * Cout)
    m = jnp.pad(m, ((0, 0), (0, lp - W * Cin), (0, lp - W * Cout)))
    return m                                              # (KH, lp, lp)


def _bn_lane_row(vec_c, W, lp):
    """Tile a per-channel BN vector over W and pad to the lane width."""
    wc = W * vec_c.shape[0]
    return jnp.pad(jnp.tile(vec_c, W), (0, lp - wc))


def _pick_batch_tile(B, H):
    """Images per grid step: target >=128-row matmuls, keep >=2 grid steps when
    possible (v7x megacore sharding), require 8-row tile alignment."""
    rpi = H + 4
    nb = min(B, max(1, -(-128 // rpi)))          # ceil(128 / rows-per-image)
    while nb > 1 and B // nb < 2:                # keep >= 2 grid steps if we can
        nb -= 1
    while nb >= 1:
        if B % nb == 0 and (nb * rpi) % 8 == 0:
            return nb
        nb -= 1
    return B                                     # single block covering everything


def basic_block_pallas(x_nchw, params):
    """Forward pass of the BasicBlock. x_nchw: (B, C, H, W) float32."""
    x = jnp.transpose(x_nchw, (0, 2, 3, 1)).astype(jnp.float32)    # NHWC
    B, H, W, C = x.shape
    WC = W * C
    # TODO(synk): at realistic ResNet shapes (W*C >> 128) switch to a
    # channels-on-lanes formulation (K = 9*C weights, shifted H/W tap loads,
    # TH+4 halo row windows); the banded-W matrices below only make sense
    # while W*C <= 128.
    assert WC <= LANE, "banded-W layout requires W*C <= 128"
    LP = LANE
    NB = _pick_batch_tile(B, H)
    steps = B // NB
    RPI = H + 4

    # Lane-dense row slabs; a 2-row zero halo per image provides conv1's H
    # padding and separates images once they are stacked along the row axis.
    xp = jnp.pad(x.reshape(B, H, WC), ((0, 0), (2, 2), (0, LP - WC)))
    xp2d = xp.reshape(B * RPI, LP)

    # torch conv weights (O, I, kh, kw) -> (kh, kw, I, O) -> banded taps, bf16.
    w1 = jnp.transpose(params["w1_oihw"], (2, 3, 1, 0)).astype(jnp.float32)
    w2 = jnp.transpose(params["w2_oihw"], (2, 3, 1, 0)).astype(jnp.float32)
    w1b = _banded_conv_taps(w1, W, LP).astype(jnp.bfloat16)
    w2b = _banded_conv_taps(w2, W, LP).astype(jnp.bfloat16)

    s1, b1 = _fold_bn(params["g1"], params["b1"], params["m1"], params["v1"])
    s2, b2 = _fold_bn(params["g2"], params["b2"], params["m2"], params["v2"])
    bn_rows = jnp.stack([_bn_lane_row(s1, W, LP), _bn_lane_row(b1, W, LP),
                         _bn_lane_row(s2, W, LP), _bn_lane_row(b2, W, LP)])

    kernel = _make_kernel(H, NB)

    def build(single_buffer_consts):
        const_kw = ({"pipeline_mode": pl.Buffered(1)}
                    if single_buffer_consts else {})
        in_specs = [
            pl.BlockSpec((NB * RPI, LP), lambda r: (r, 0)),        # windowed rows
            pl.BlockSpec((3, LP, LP), lambda r: (0, 0, 0), **const_kw),
            pl.BlockSpec((3, LP, LP), lambda r: (0, 0, 0), **const_kw),
            pl.BlockSpec((4, LP), lambda r: (0, 0), **const_kw),
        ]
        return pl.pallas_call(
            kernel,
            out_shape=jax.ShapeDtypeStruct((B * H, LP), jnp.float32),
            grid=(steps,),
            in_specs=in_specs,
            out_specs=pl.BlockSpec((NB * H, LP), lambda r: (r, 0)),
            compiler_params=pltpu.CompilerParams(
                dimension_semantics=("parallel",)),
        )

    try:
        # Single-buffer the constant operands (weights / BN rows): their index
        # maps are grid-invariant, so double-buffering them is pure VMEM waste.
        out2d = jax.block_until_ready(build(True)(xp2d, w1b, w2b, bn_rows))
    except Exception:
        # Fallback if pipeline_mode=pl.Buffered(1) is unsupported in this jax.
        out2d = build(False)(xp2d, w1b, w2b, bn_rows)

    out = out2d.reshape(B, H, LP)[:, :, :WC].reshape(B, H, W, C)
    # TODO(synk): when chaining BasicBlocks, keep activations in the lane-dense
    # slab layout across blocks and convert NCHW <-> slab only at network edges.
    return jnp.transpose(out, (0, 3, 1, 2))      # back to NCHW


def basic_block_reference(x_nchw, params):
    """Pure-JAX reference with the same bf16-operand / f32-accumulate conv
    numerics as the kernel (BN / ReLU / residual in f32)."""
    def conv(x, w_oihw):
        return jax.lax.conv_general_dilated(
            x.astype(jnp.bfloat16), w_oihw.astype(jnp.bfloat16),
            window_strides=(1, 1), padding=((1, 1), (1, 1)),
            dimension_numbers=("NCHW", "OIHW", "NCHW"),
            preferred_element_type=jnp.float32)

    def bn(x, g, b, m, v):
        s = g / jnp.sqrt(v + EPS)
        sh = b - m * s
        return x * s[None, :, None, None] + sh[None, :, None, None]

    x = x_nchw.astype(jnp.float32)
    h = jax.nn.relu(bn(conv(x, params["w1_oihw"]),
                       params["g1"], params["b1"], params["m1"], params["v1"]))
    y = bn(conv(h, params["w2_oihw"]),
           params["g2"], params["b2"], params["m2"], params["v2"])
    return jax.nn.relu(y + x)


def make_params(key, planes):
    ks = jax.random.split(key, 8)
    c = planes
    return {
        # conv3x3 weights, PyTorch (O, I, kh, kw) convention
        "w1_oihw": 0.1 * jax.random.normal(ks[0], (c, c, 3, 3), jnp.float32),
        "w2_oihw": 0.1 * jax.random.normal(ks[1], (c, c, 3, 3), jnp.float32),
        # bn1 (gamma, beta, running_mean, running_var)
        "g1": 1.0 + 0.1 * jax.random.normal(ks[2], (c,), jnp.float32),
        "b1": 0.1 * jax.random.normal(ks[3], (c,), jnp.float32),
        "m1": 0.05 * jax.random.normal(ks[4], (c,), jnp.float32),
        "v1": 1.0 + 0.1 * jax.nn.softplus(
            jax.random.normal(ks[5], (c,), jnp.float32)),
        # bn2
        "g2": 1.0 + 0.1 * jax.random.normal(ks[6], (c,), jnp.float32),
        "b2": 0.1 * jax.random.normal(ks[7], (c,), jnp.float32),
        "m2": jnp.linspace(-0.1, 0.1, c, dtype=jnp.float32),
        "v2": jnp.linspace(0.9, 1.1, c, dtype=jnp.float32),
    }


if __name__ == "__main__":
    # inplanes == planes == 4, stride == 1 -> enable_skip = False, residual = x
    B, C, H, W = 4, 4, 16, 16
    key = jax.random.PRNGKey(0)
    kx, kp = jax.random.split(key)
    x = jax.random.normal(kx, (B, C, H, W), jnp.float32)
    params = make_params(kp, C)

    out = jax.block_until_ready(basic_block_pallas(x, params))
    ref = jax.block_until_ready(basic_block_reference(x, params))
    assert out.shape == (B, C, H, W), out.shape
    max_err = float(jnp.max(jnp.abs(out - ref)))
    assert jnp.allclose(out, ref, atol=1e-2, rtol=1e-2), max_err

    # TODO(synk): other args.keyword configurations (fixup scale/bias, DCHR
    # skip, downsample/avg-pool skip, base>1 multi-branch, quantized convs)
    # are construction-time variants of this module and are not instantiated.
    print("KERNEL_OK")
</pallas_src>

<mosaic_0001>
module attributes {stable_mosaic.version = 11 : i64} {
  func.func @kernel(%arg0: i32, %arg1: memref<40x128xf32, #tpu.memory_space<vmem>>, %arg2: memref<3x128x128xbf16, #tpu.memory_space<vmem>>, %arg3: memref<3x128x128xbf16, #tpu.memory_space<vmem>>, %arg4: memref<4x128xf32, #tpu.memory_space<vmem>>, %arg5: memref<32x128xf32, #tpu.memory_space<vmem>>) attributes {dimension_semantics = [#tpu.dimension_semantics<parallel>], iteration_bounds = array<i64: 2>, scalar_prefetch = 0 : i64, scratch_operands = 0 : i64, tpu.core_type = #tpu.core_type<tc>, window_params = [{transform_indices = @transform_0, window_bounds = array<i64: 40, 128>}, {pipeline_mode = #tpu.pipeline_mode<synchronous>, transform_indices = @transform_1, window_bounds = array<i64: 3, 128, 128>}, {pipeline_mode = #tpu.pipeline_mode<synchronous>, transform_indices = @transform_2, window_bounds = array<i64: 3, 128, 128>}, {pipeline_mode = #tpu.pipeline_mode<synchronous>, transform_indices = @transform_3, window_bounds = array<i64: 4, 128>}, {transform_indices = @transform_4, window_bounds = array<i64: 32, 128>}]} {
    %c0 = arith.constant 0 : index
    %c0_0 = arith.constant 0 : index
    %0 = vector.load %arg4[%c0, %c0_0] : memref<4x128xf32, #tpu.memory_space<vmem>>, vector<1x128xf32>
    %c1 = arith.constant 1 : index
    %c0_1 = arith.constant 0 : index
    %1 = vector.load %arg4[%c1, %c0_1] : memref<4x128xf32, #tpu.memory_space<vmem>>, vector<1x128xf32>
    %c2 = arith.constant 2 : index
    %c0_2 = arith.constant 0 : index
    %2 = vector.load %arg4[%c2, %c0_2] : memref<4x128xf32, #tpu.memory_space<vmem>>, vector<1x128xf32>
    %c3 = arith.constant 3 : index
    %c0_3 = arith.constant 0 : index
    %3 = vector.load %arg4[%c3, %c0_3] : memref<4x128xf32, #tpu.memory_space<vmem>>, vector<1x128xf32>
    %c0_4 = arith.constant 0 : index
    %c0_5 = arith.constant 0 : index
    %4 = vector.load %arg1[%c0_4, %c0_5] : memref<40x128xf32, #tpu.memory_space<vmem>>, vector<38x128xf32>
    %c1_6 = arith.constant 1 : index
    %c0_7 = arith.constant 0 : index
    %5 = vector.load %arg1[%c1_6, %c0_7] : memref<40x128xf32, #tpu.memory_space<vmem>>, vector<38x128xf32>
    %c2_8 = arith.constant 2 : index
    %c0_9 = arith.constant 0 : index
    %6 = vector.load %arg1[%c2_8, %c0_9] : memref<40x128xf32, #tpu.memory_space<vmem>>, vector<38x128xf32>
    %7 = arith.truncf %4 : vector<38x128xf32> to vector<38x128xbf16>
    %c0_10 = arith.constant 0 : index
    %c0_11 = arith.constant 0 : index
    %c0_12 = arith.constant 0 : index
    %8 = vector.load %arg2[%c0_10, %c0_11, %c0_12] : memref<3x128x128xbf16, #tpu.memory_space<vmem>>, vector<1x128x128xbf16>
    %9 = vector.shape_cast %8 : vector<1x128x128xbf16> to vector<128x128xbf16>
    %cst = arith.constant dense<0.000000e+00> : vector<38x128xf32>
    %10 = tpu.matmul %7, %9, %cst {dimension_numbers = #tpu.dot_dimension_numbers<[1], [0], [0], [1], [0, 0, 1, 1], [], []>} : vector<38x128xbf16>, vector<128x128xbf16>, vector<38x128xf32> -> vector<38x128xf32>
    %11 = arith.truncf %5 : vector<38x128xf32> to vector<38x128xbf16>
    %c1_13 = arith.constant 1 : index
    %c0_14 = arith.constant 0 : index
    %c0_15 = arith.constant 0 : index
    %12 = vector.load %arg2[%c1_13, %c0_14, %c0_15] : memref<3x128x128xbf16, #tpu.memory_space<vmem>>, vector<1x128x128xbf16>
    %13 = vector.shape_cast %12 : vector<1x128x128xbf16> to vector<128x128xbf16>
    %cst_16 = arith.constant dense<0.000000e+00> : vector<38x128xf32>
    %14 = tpu.matmul %11, %13, %cst_16 {dimension_numbers = #tpu.dot_dimension_numbers<[1], [0], [0], [1], [0, 0, 1, 1], [], []>} : vector<38x128xbf16>, vector<128x128xbf16>, vector<38x128xf32> -> vector<38x128xf32>
    %15 = arith.addf %10, %14 : vector<38x128xf32>
    %16 = arith.truncf %6 : vector<38x128xf32> to vector<38x128xbf16>
    %c2_17 = arith.constant 2 : index
    %c0_18 = arith.constant 0 : index
    %c0_19 = arith.constant 0 : index
    %17 = vector.load %arg2[%c2_17, %c0_18, %c0_19] : memref<3x128x128xbf16, #tpu.memory_space<vmem>>, vector<1x128x128xbf16>
    %18 = vector.shape_cast %17 : vector<1x128x128xbf16> to vector<128x128xbf16>
    %cst_20 = arith.constant dense<0.000000e+00> : vector<38x128xf32>
    %19 = tpu.matmul %16, %18, %cst_20 {dimension_numbers = #tpu.dot_dimension_numbers<[1], [0], [0], [1], [0, 0, 1, 1], [], []>} : vector<38x128xbf16>, vector<128x128xbf16>, vector<38x128xf32> -> vector<38x128xf32>
    %20 = arith.addf %15, %19 : vector<38x128xf32>
    %21 = vector.broadcast %0 : vector<1x128xf32> to vector<38x128xf32>
    %22 = arith.mulf %20, %21 : vector<38x128xf32>
    %23 = vector.broadcast %1 : vector<1x128xf32> to vector<38x128xf32>
    %24 = arith.addf %22, %23 : vector<38x128xf32>
    %cst_21 = arith.constant 0.000000e+00 : f32
    %25 = vector.broadcast %cst_21 : f32 to vector<38x128xf32>
    %26 = arith.maximumf %24, %25 : vector<38x128xf32>
    %27 = tpu.iota {dimensions = array<i32: 0>} : vector<38x1xi32>
    %c0_i32 = arith.constant 0 : i32
    %28 = vector.broadcast %c0_i32 : i32 to vector<38x1xi32>
    %29 = arith.cmpi eq, %27, %28 : vector<38x1xi32>
    %c17_i32 = arith.constant 17 : i32
    %30 = vector.broadcast %c17_i32 : i32 to vector<38x1xi32>
    %31 = arith.cmpi eq, %27, %30 : vector<38x1xi32>
    %32 = arith.ori %29, %31 : vector<38x1xi1>
    %c20_i32 = arith.constant 20 : i32
    %33 = vector.broadcast %c20_i32 : i32 to vector<38x1xi32>
    %34 = arith.cmpi eq, %27, %33 : vector<38x1xi32>
    %35 = arith.ori %32, %34 : vector<38x1xi1>
    %c37_i32 = arith.constant 37 : i32
    %36 = vector.broadcast %c37_i32 : i32 to vector<38x1xi32>
    %37 = arith.cmpi eq, %27, %36 : vector<38x1xi32>
    %38 = arith.ori %35, %37 : vector<38x1xi1>
    %cst_22 = arith.constant 0.000000e+00 : f32
    %cst_23 = arith.constant 1.000000e+00 : f32
    %39 = vector.broadcast %cst_22 : f32 to vector<38x1xf32>
    %40 = vector.broadcast %cst_23 : f32 to vector<38x1xf32>
    %41 = arith.select %38, %39, %40 : vector<38x1xi1>, vector<38x1xf32>
    %42 = vector.broadcast %41 : vector<38x1xf32> to vector<38x128xf32>
    %43 = arith.mulf %26, %42 : vector<38x128xf32>
    %44 = arith.truncf %43 : vector<38x128xf32> to vector<38x128xbf16>
    %45 = vector.extract_strided_slice %44 {offsets = [0, 0], sizes = [36, 128], strides = [1, 1]} : vector<38x128xbf16> to vector<36x128xbf16>
    %c0_24 = arith.constant 0 : index
    %c0_25 = arith.constant 0 : index
    %c0_26 = arith.constant 0 : index
    %46 = vector.load %arg3[%c0_24, %c0_25, %c0_26] : memref<3x128x128xbf16, #tpu.memory_space<vmem>>, vector<1x128x128xbf16>
    %47 = vector.shape_cast %46 : vector<1x128x128xbf16> to vector<128x128xbf16>
    %cst_27 = arith.constant dense<0.000000e+00> : vector<36x128xf32>
    %48 = tpu.matmul %45, %47, %cst_27 {dimension_numbers = #tpu.dot_dimension_numbers<[1], [0], [0], [1], [0, 0, 1, 1], [], []>} : vector<36x128xbf16>, vector<128x128xbf16>, vector<36x128xf32> -> vector<36x128xf32>
    %49 = vector.extract_strided_slice %44 {offsets = [1, 0], sizes = [36, 128], strides = [1, 1]} : vector<38x128xbf16> to vector<36x128xbf16>
    %c1_28 = arith.constant 1 : index
    %c0_29 = arith.constant 0 : index
    %c0_30 = arith.constant 0 : index
    %50 = vector.load %arg3[%c1_28, %c0_29, %c0_30] : memref<3x128x128xbf16, #tpu.memory_space<vmem>>, vector<1x128x128xbf16>
    %51 = vector.shape_cast %50 : vector<1x128x128xbf16> to vector<128x128xbf16>
    %cst_31 = arith.constant dense<0.000000e+00> : vector<36x128xf32>
    %52 = tpu.matmul %49, %51, %cst_31 {dimension_numbers = #tpu.dot_dimension_numbers<[1], [0], [0], [1], [0, 0, 1, 1], [], []>} : vector<36x128xbf16>, vector<128x128xbf16>, vector<36x128xf32> -> vector<36x128xf32>
    %53 = arith.addf %48, %52 : vector<36x128xf32>
    %54 = vector.extract_strided_slice %44 {offsets = [2, 0], sizes = [36, 128], strides = [1, 1]} : vector<38x128xbf16> to vector<36x128xbf16>
    %c2_32 = arith.constant 2 : index
    %c0_33 = arith.constant 0 : index
    %c0_34 = arith.constant 0 : index
    %55 = vector.load %arg3[%c2_32, %c0_33, %c0_34] : memref<3x128x128xbf16, #tpu.memory_space<vmem>>, vector<1x128x128xbf16>
    %56 = vector.shape_cast %55 : vector<1x128x128xbf16> to vector<128x128xbf16>
    %cst_35 = arith.constant dense<0.000000e+00> : vector<36x128xf32>
    %57 = tpu.matmul %54, %56, %cst_35 {dimension_numbers = #tpu.dot_dimension_numbers<[1], [0], [0], [1], [0, 0, 1, 1], [], []>} : vector<36x128xbf16>, vector<128x128xbf16>, vector<36x128xf32> -> vector<36x128xf32>
    %58 = arith.addf %53, %57 : vector<36x128xf32>
    %59 = vector.broadcast %2 : vector<1x128xf32> to vector<36x128xf32>
    %60 = arith.mulf %58, %59 : vector<36x128xf32>
    %61 = vector.broadcast %3 : vector<1x128xf32> to vector<36x128xf32>
    %62 = arith.addf %60, %61 : vector<36x128xf32>
    %63 = vector.extract_strided_slice %6 {offsets = [0, 0], sizes = [36, 128], strides = [1, 1]} : vector<38x128xf32> to vector<36x128xf32>
    %64 = arith.addf %62, %63 : vector<36x128xf32>
    %cst_36 = arith.constant 0.000000e+00 : f32
    %65 = vector.broadcast %cst_36 : f32 to vector<36x128xf32>
    %66 = arith.maximumf %64, %65 : vector<36x128xf32>
    %67 = vector.extract_strided_slice %66 {offsets = [0, 0], sizes = [16, 128], strides = [1, 1]} : vector<36x128xf32> to vector<16x128xf32>
    %c0_37 = arith.constant 0 : index
    %c0_38 = arith.constant 0 : index
    %68 = vector.load %arg5[%c0_37, %c0_38] : memref<32x128xf32, #tpu.memory_space<vmem>>, vector<16x128xf32>
    tpu.vector_store %arg5[%c0_37, %c0_38], %67 {strides = array<i32>} : memref<32x128xf32, #tpu.memory_space<vmem>>, vector<16x128xf32>,
    %69 = vector.extract_strided_slice %66 {offsets = [20, 0], sizes = [16, 128], strides = [1, 1]} : vector<36x128xf32> to vector<16x128xf32>
    %c16 = arith.constant 16 : index
    %c0_39 = arith.constant 0 : index
    %70 = vector.load %arg5[%c16, %c0_39] : memref<32x128xf32, #tpu.memory_space<vmem>>, vector<16x128xf32>
    tpu.vector_store %arg5[%c16, %c0_39], %69 {strides = array<i32>} : memref<32x128xf32, #tpu.memory_space<vmem>>, vector<16x128xf32>,
    return
  }
  func.func @transform_0(%arg0: i32) -> (i32, i32) {
    %c0_i32 = arith.constant 0 : i32
    %c0_i32_0 = arith.constant 0 : i32
    return %arg0, %c0_i32 : i32, i32
  }
  func.func @transform_1(%arg0: i32) -> (i32, i32, i32) {
    %c0_i32 = arith.constant 0 : i32
    %c0_i32_0 = arith.constant 0 : i32
    %c0_i32_1 = arith.constant 0 : i32
    %c0_i32_2 = arith.constant 0 : i32
    return %c0_i32, %c0_i32_0, %c0_i32_1 : i32, i32, i32
  }
  func.func @transform_2(%arg0: i32) -> (i32, i32, i32) {
    %c0_i32 = arith.constant 0 : i32
    %c0_i32_0 = arith.constant 0 : i32
    %c0_i32_1 = arith.constant 0 : i32
    %c0_i32_2 = arith.constant 0 : i32
    return %c0_i32, %c0_i32_0, %c0_i32_1 : i32, i32, i32
  }
  func.func @transform_3(%arg0: i32) -> (i32, i32) {
    %c0_i32 = arith.constant 0 : i32
    %c0_i32_0 = arith.constant 0 : i32
    %c0_i32_1 = arith.constant 0 : i32
    return %c0_i32, %c0_i32_0 : i32, i32
  }
  func.func @transform_4(%arg0: i32) -> (i32, i32) {
    %c0_i32 = arith.constant 0 : i32
    %c0_i32_0 = arith.constant 0 : i32
    return %arg0, %c0_i32 : i32, i32
  }
}

module attributes {stable_mosaic.version = 11 : i64} {
  func.func @kernel(%arg0: i32, %arg1: memref<40x128xf32, #tpu.memory_space<vmem>>, %arg2: memref<3x128x128xbf16, #tpu.memory_space<vmem>>, %arg3: memref<3x128x128xbf16, #tpu.memory_space<vmem>>, %arg4: memref<4x128xf32, #tpu.memory_space<vmem>>, %arg5: memref<32x128xf32, #tpu.memory_space<vmem>>) attributes {dimension_semantics = [#tpu.dimension_semantics<parallel>], iteration_bounds = array<i64: 2>, scalar_prefetch = 0 : i64, scratch_operands = 0 : i64, tpu.core_type = #tpu.core_type<tc>, window_params = [{transform_indices = @transform_0, window_bounds = array<i64: 40, 128>}, {pipeline_mode = #tpu.pipeline_mode<synchronous>, transform_indices = @transform_1, window_bounds = array<i64: 3, 128, 128>}, {pipeline_mode = #tpu.pipeline_mode<synchronous>, transform_indices = @transform_2, window_bounds = array<i64: 3, 128, 128>}, {pipeline_mode = #tpu.pipeline_mode<synchronous>, transform_indices = @transform_3, window_bounds = array<i64: 4, 128>}, {transform_indices = @transform_4, window_bounds = array<i64: 32, 128>}]} {
    %c0 = arith.constant 0 : index
    %c0_0 = arith.constant 0 : index
    %0 = vector.load %arg4[%c0, %c0_0] : memref<4x128xf32, #tpu.memory_space<vmem>>, vector<1x128xf32>
    %c1 = arith.constant 1 : index
    %c0_1 = arith.constant 0 : index
    %1 = vector.load %arg4[%c1, %c0_1] : memref<4x128xf32, #tpu.memory_space<vmem>>, vector<1x128xf32>
    %c2 = arith.constant 2 : index
    %c0_2 = arith.constant 0 : index
    %2 = vector.load %arg4[%c2, %c0_2] : memref<4x128xf32, #tpu.memory_space<vmem>>, vector<1x128xf32>
    %c3 = arith.constant 3 : index
    %c0_3 = arith.constant 0 : index
    %3 = vector.load %arg4[%c3, %c0_3] : memref<4x128xf32, #tpu.memory_space<vmem>>, vector<1x128xf32>
    %c0_4 = arith.constant 0 : index
    %c0_5 = arith.constant 0 : index
    %4 = vector.load %arg1[%c0_4, %c0_5] : memref<40x128xf32, #tpu.memory_space<vmem>>, vector<38x128xf32>
    %c1_6 = arith.constant 1 : index
    %c0_7 = arith.constant 0 : index
    %5 = vector.load %arg1[%c1_6, %c0_7] : memref<40x128xf32, #tpu.memory_space<vmem>>, vector<38x128xf32>
    %c2_8 = arith.constant 2 : index
    %c0_9 = arith.constant 0 : index
    %6 = vector.load %arg1[%c2_8, %c0_9] : memref<40x128xf32, #tpu.memory_space<vmem>>, vector<38x128xf32>
    %7 = arith.truncf %4 : vector<38x128xf32> to vector<38x128xbf16>
    %c0_10 = arith.constant 0 : index
    %c0_11 = arith.constant 0 : index
    %c0_12 = arith.constant 0 : index
    %8 = vector.load %arg2[%c0_10, %c0_11, %c0_12] : memref<3x128x128xbf16, #tpu.memory_space<vmem>>, vector<1x128x128xbf16>
    %9 = vector.shape_cast %8 : vector<1x128x128xbf16> to vector<128x128xbf16>
    %cst = arith.constant dense<0.000000e+00> : vector<38x128xf32>
    %10 = tpu.matmul %7, %9, %cst {dimension_numbers = #tpu.dot_dimension_numbers<[1], [0], [0], [1], [0, 0, 1, 1], [], []>} : vector<38x128xbf16>, vector<128x128xbf16>, vector<38x128xf32> -> vector<38x128xf32>
    %11 = arith.truncf %5 : vector<38x128xf32> to vector<38x128xbf16>
    %c1_13 = arith.constant 1 : index
    %c0_14 = arith.constant 0 : index
    %c0_15 = arith.constant 0 : index
    %12 = vector.load %arg2[%c1_13, %c0_14, %c0_15] : memref<3x128x128xbf16, #tpu.memory_space<vmem>>, vector<1x128x128xbf16>
    %13 = vector.shape_cast %12 : vector<1x128x128xbf16> to vector<128x128xbf16>
    %cst_16 = arith.constant dense<0.000000e+00> : vector<38x128xf32>
    %14 = tpu.matmul %11, %13, %cst_16 {dimension_numbers = #tpu.dot_dimension_numbers<[1], [0], [0], [1], [0, 0, 1, 1], [], []>} : vector<38x128xbf16>, vector<128x128xbf16>, vector<38x128xf32> -> vector<38x128xf32>
    %15 = arith.addf %10, %14 : vector<38x128xf32>
    %16 = arith.truncf %6 : vector<38x128xf32> to vector<38x128xbf16>
    %c2_17 = arith.constant 2 : index
    %c0_18 = arith.constant 0 : index
    %c0_19 = arith.constant 0 : index
    %17 = vector.load %arg2[%c2_17, %c0_18, %c0_19] : memref<3x128x128xbf16, #tpu.memory_space<vmem>>, vector<1x128x128xbf16>
    %18 = vector.shape_cast %17 : vector<1x128x128xbf16> to vector<128x128xbf16>
    %cst_20 = arith.constant dense<0.000000e+00> : vector<38x128xf32>
    %19 = tpu.matmul %16, %18, %cst_20 {dimension_numbers = #tpu.dot_dimension_numbers<[1], [0], [0], [1], [0, 0, 1, 1], [], []>} : vector<38x128xbf16>, vector<128x128xbf16>, vector<38x128xf32> -> vector<38x128xf32>
    %20 = arith.addf %15, %19 : vector<38x128xf32>
    %21 = vector.broadcast %0 : vector<1x128xf32> to vector<38x128xf32>
    %22 = arith.mulf %20, %21 : vector<38x128xf32>
    %23 = vector.broadcast %1 : vector<1x128xf32> to vector<38x128xf32>
    %24 = arith.addf %22, %23 : vector<38x128xf32>
    %cst_21 = arith.constant 0.000000e+00 : f32
    %25 = vector.broadcast %cst_21 : f32 to vector<38x128xf32>
    %26 = arith.maximumf %24, %25 : vector<38x128xf32>
    %27 = tpu.iota {dimensions = array<i32: 0>} : vector<38x1xi32>
    %c0_i32 = arith.constant 0 : i32
    %28 = vector.broadcast %c0_i32 : i32 to vector<38x1xi32>
    %29 = arith.cmpi eq, %27, %28 : vector<38x1xi32>
    %c17_i32 = arith.constant 17 : i32
    %30 = vector.broadcast %c17_i32 : i32 to vector<38x1xi32>
    %31 = arith.cmpi eq, %27, %30 : vector<38x1xi32>
    %32 = arith.ori %29, %31 : vector<38x1xi1>
    %c20_i32 = arith.constant 20 : i32
    %33 = vector.broadcast %c20_i32 : i32 to vector<38x1xi32>
    %34 = arith.cmpi eq, %27, %33 : vector<38x1xi32>
    %35 = arith.ori %32, %34 : vector<38x1xi1>
    %c37_i32 = arith.constant 37 : i32
    %36 = vector.broadcast %c37_i32 : i32 to vector<38x1xi32>
    %37 = arith.cmpi eq, %27, %36 : vector<38x1xi32>
    %38 = arith.ori %35, %37 : vector<38x1xi1>
    %cst_22 = arith.constant 0.000000e+00 : f32
    %cst_23 = arith.constant 1.000000e+00 : f32
    %39 = vector.broadcast %cst_22 : f32 to vector<38x1xf32>
    %40 = vector.broadcast %cst_23 : f32 to vector<38x1xf32>
    %41 = arith.select %38, %39, %40 : vector<38x1xi1>, vector<38x1xf32>
    %42 = vector.broadcast %41 : vector<38x1xf32> to vector<38x128xf32>
    %43 = arith.mulf %26, %42 : vector<38x128xf32>
    %44 = arith.truncf %43 : vector<38x128xf32> to vector<38x128xbf16>
    %45 = vector.extract_strided_slice %44 {offsets = [0, 0], sizes = [36, 128], strides = [1, 1]} : vector<38x128xbf16> to vector<36x128xbf16>
    %c0_24 = arith.constant 0 : index
    %c0_25 = arith.constant 0 : index
    %c0_26 = arith.constant 0 : index
    %46 = vector.load %arg3[%c0_24, %c0_25, %c0_26] : memref<3x128x128xbf16, #tpu.memory_space<vmem>>, vector<1x128x128xbf16>
    %47 = vector.shape_cast %46 : vector<1x128x128xbf16> to vector<128x128xbf16>
    %cst_27 = arith.constant dense<0.000000e+00> : vector<36x128xf32>
    %48 = tpu.matmul %45, %47, %cst_27 {dimension_numbers = #tpu.dot_dimension_numbers<[1], [0], [0], [1], [0, 0, 1, 1], [], []>} : vector<36x128xbf16>, vector<128x128xbf16>, vector<36x128xf32> -> vector<36x128xf32>
    %49 = vector.extract_strided_slice %44 {offsets = [1, 0], sizes = [36, 128], strides = [1, 1]} : vector<38x128xbf16> to vector<36x128xbf16>
    %c1_28 = arith.constant 1 : index
    %c0_29 = arith.constant 0 : index
    %c0_30 = arith.constant 0 : index
    %50 = vector.load %arg3[%c1_28, %c0_29, %c0_30] : memref<3x128x128xbf16, #tpu.memory_space<vmem>>, vector<1x128x128xbf16>
    %51 = vector.shape_cast %50 : vector<1x128x128xbf16> to vector<128x128xbf16>
    %cst_31 = arith.constant dense<0.000000e+00> : vector<36x128xf32>
    %52 = tpu.matmul %49, %51, %cst_31 {dimension_numbers = #tpu.dot_dimension_numbers<[1], [0], [0], [1], [0, 0, 1, 1], [], []>} : vector<36x128xbf16>, vector<128x128xbf16>, vector<36x128xf32> -> vector<36x128xf32>
    %53 = arith.addf %48, %52 : vector<36x128xf32>
    %54 = vector.extract_strided_slice %44 {offsets = [2, 0], sizes = [36, 128], strides = [1, 1]} : vector<38x128xbf16> to vector<36x128xbf16>
    %c2_32 = arith.constant 2 : index
    %c0_33 = arith.constant 0 : index
    %c0_34 = arith.constant 0 : index
    %55 = vector.load %arg3[%c2_32, %c0_33, %c0_34] : memref<3x128x128xbf16, #tpu.memory_space<vmem>>, vector<1x128x128xbf16>
    %56 = vector.shape_cast %55 : vector<1x128x128xbf16> to vector<128x128xbf16>
    %cst_35 = arith.constant dense<0.000000e+00> : vector<36x128xf32>
    %57 = tpu.matmul %54, %56, %cst_35 {dimension_numbers = #tpu.dot_dimension_numbers<[1], [0], [0], [1], [0, 0, 1, 1], [], []>} : vector<36x128xbf16>, vector<128x128xbf16>, vector<36x128xf32> -> vector<36x128xf32>
    %58 = arith.addf %53, %57 : vector<36x128xf32>
    %59 = vector.broadcast %2 : vector<1x128xf32> to vector<36x128xf32>
    %60 = arith.mulf %58, %59 : vector<36x128xf32>
    %61 = vector.broadcast %3 : vector<1x128xf32> to vector<36x128xf32>
    %62 = arith.addf %60, %61 : vector<36x128xf32>
    %63 = vector.extract_strided_slice %6 {offsets = [0, 0], sizes = [36, 128], strides = [1, 1]} : vector<38x128xf32> to vector<36x128xf32>
    %64 = arith.addf %62, %63 : vector<36x128xf32>
    %cst_36 = arith.constant 0.000000e+00 : f32
    %65 = vector.broadcast %cst_36 : f32 to vector<36x128xf32>
    %66 = arith.maximumf %64, %65 : vector<36x128xf32>
    %67 = vector.extract_strided_slice %66 {offsets = [0, 0], sizes = [16, 128], strides = [1, 1]} : vector<36x128xf32> to vector<16x128xf32>
    %c0_37 = arith.constant 0 : index
    %c0_38 = arith.constant 0 : index
    %68 = vector.load %arg5[%c0_37, %c0_38] : memref<32x128xf32, #tpu.memory_space<vmem>>, vector<16x128xf32>
    tpu.vector_store %arg5[%c0_37, %c0_38], %67 {strides = array<i32>} : memref<32x128xf32, #tpu.memory_space<vmem>>, vector<16x128xf32>,
    %69 = vector.extract_strided_slice %66 {offsets = [20, 0], sizes = [16, 128], strides = [1, 1]} : vector<36x128xf32> to vector<16x128xf32>
    %c16 = arith.constant 16 : index
    %c0_39 = arith.constant 0 : index
    %70 = vector.load %arg5[%c16, %c0_39] : memref<32x128xf32, #tpu.memory_space<vmem>>, vector<16x128xf32>
    tpu.vector_store %arg5[%c16, %c0_39], %69 {strides = array<i32>} : memref<32x128xf32, #tpu.memory_space<vmem>>, vector<16x128xf32>,
    return
  }
  func.func @transform_0(%arg0: i32) -> (i32, i32) {
    %c0_i32 = arith.constant 0 : i32
    %c0_i32_0 = arith.constant 0 : i32
    return %arg0, %c0_i32 : i32, i32
  }
  func.func @transform_1(%arg0: i32) -> (i32, i32, i32) {
    %c0_i32 = arith.constant 0 : i32
    %c0_i32_0 = arith.constant 0 : i32
    %c0_i32_1 = arith.constant 0 : i32
    %c0_i32_2 = arith.constant 0 : i32
    return %c0_i32, %c0_i32_0, %c0_i32_1 : i32, i32, i32
  }
  func.func @transform_2(%arg0: i32) -> (i32, i32, i32) {
    %c0_i32 = arith.constant 0 : i32
    %c0_i32_0 = arith.constant 0 : i32
    %c0_i32_1 = arith.constant 0 : i32
    %c0_i32_2 = arith.constant 0 : i32
    return %c0_i32, %c0_i32_0, %c0_i32_1 : i32, i32, i32
  }
  func.func @transform_3(%arg0: i32) -> (i32, i32) {
    %c0_i32 = arith.constant 0 : i32
    %c0_i32_0 = arith.constant 0 : i32
    %c0_i32_1 = arith.constant 0 : i32
    return %c0_i32, %c0_i32_0 : i32, i32
  }
  func.func @transform_4(%arg0: i32) -> (i32, i32) {
    %c0_i32 = arith.constant 0 : i32
    %c0_i32_0 = arith.constant 0 : i32
    return %arg0, %c0_i32 : i32, i32
  }
}

</mosaic_0001>

<bundles_post_ra>
// kernel: tpu_custom_call.1
= control target key start
LH: loop header
LB: loop body
LE: loop exit
PB: predicated region body
PF: predicated region fallthrough
CT: control target
= control target key end

     0   :  { %9 = vsyncpa [#allocation3], 0  ;;  %s2336_s0 = inlined_call_operand.hbm [shape: f32[80,128], index: 0, kind: input, shape index: {}]   ;;  %s2337_s1 = inlined_call_operand.hbm [shape: bf16[3,128,128], index: 1, kind: input, shape index: {}]   ;;  %s2338_s2 = inlined_call_operand.hbm [shape: bf16[3,128,128], index: 2, kind: input, shape index: {}]   ;;  %s2339_s3 = inlined_call_operand.vmem [shape: f32[4,128], index: 3, kind: input, shape index: {}]   ;;  %s2340_s4 = inlined_call_operand.hbm [shape: f32[64,128], index: 4, kind: output, shape index: {}]  }
   0x1   :  { %11 = vsyncpa [#allocation3 + $0x1], 0 }
   0x2   :  { %12 = vsyncpa [#allocation6], 0 }
   0x3   :  { %13 = vsyncpa [#allocation4], 0 }
   0x4   :  { %15 = vsyncpa [#allocation4 + $0x1], 0  ;;  %s1938_s15 = smov 0   ;;  %s1940_s16 = smov 0  }
   0x5   :  { %s1942_s17 = smov 0   ;;  %s1944_s18 = smov 0  }
   0x6 LB: > { %s1959_s19 = sadd.s32 4294967295, %s1898_s18   ;;  %s1265_s20 = sadd.s32 4294967294, %s1898_s18   ;;  %s1898_s18 = sphi %s1944_s18, %s2360_s18   ;;  %s1894_s17 = sphi %s1942_s17, %s2359_s17   ;;  %s1890_s16 = sphi %s1940_s16, %s2358_s16   ;;  %s1886_s15 = sphi %s1938_s15, %s2357_s15  }
   0x7   : > { %p41_p0 = scmp.ne.s32.totalorder %s1890_s16, %s1886_s15  ;;  %p2341_p1 = scmp.eq.s32.totalorder %s1959_s19, 0 }
   0x8   : > { %p134_p3 = scmp.eq.s32.totalorder %s1265_s20, 1  ;;  %p1266_p5 = scmp.ge.s32.totalorder %s1898_s18, 1 }
   0x9   : > { %p1968_p4 = por %p2341_p1, %p41_p0  ;;  %p141_p7 = scmp.lt.s32.totalorder %s1898_s18, 3 }
   0xa   : > { %p1973_p6 = por %p134_p3, %p41_p0  ;;  %s1900_s24 = smov [#allocation5]  }
   0xb   : > { %s2344_s21 = scalar_select %p1968_p4, 1, 0 }
   0xc   : > { %s2345_s22 = scalar_select %p1973_p6, 1, 0 }
   0xd   : > { %p1978_p8 = pnand %p1266_p5, %p141_p7  ;;  %s153_s25 = sshll.u32 %s1900_s24, 4  ;;  %s1982_s25 = int_to_ptr.vmem [resolvable:$true] %s153_s25 }
   0xe   : > { %s1901_s27 = smov [#allocation7]   ;;  %s1742_s5 = scalar_lea.hbm %s2337_s1, 3072 }
   0xf   : > { %p1630_p9 = pneg %p1978_p8  ;;  %s166_s28 = sshll.u32 %s1901_s27, 4  ;;  %s1993_s28 = int_to_ptr.vmem [resolvable:$true] %s166_s28 }
  0x10   : > { %p1743_p12 = scmp.ne.s32.totalorder %s2337_s1, %s1742_s5  ;;  %p1749_p5 = scmp.lt.u32.totalorder %s1742_s5, %s2337_s1 }
  0x11   : > { %p1989_p11 = pnand %p1630_p9, %p2341_p1 }
  0x13   : > { %p1744_p13 = pneg %p1989_p11 }
  0x15   : > { %p1745_p0 = pnand %p1744_p13, %p1743_p12 }
  0x17   : > { %p1746_p3 = pneg %p1745_p0 }
  0x19   : > { %p1751_p7 = pnand %p1749_p5, %p1746_p3 }
  0x1b   : > { %1754 = shalt.err (!%p1751_p7)
}
  0x1c   : > { %s1755_s10 = scalar_lea.vmem %s1982_s25, 3072  ;;  %p1763_p2 = scmp.lt.s32.totalorder %s1982_s25, %s1982_s25 }
  0x1d   : > { %p1756_p9 = scmp.ne.s32.totalorder %s1982_s25, %s1755_s10  ;;  %p1764_p12 = scmp.lt.s32.totalorder %s1755_s10, %s1755_s10 }
  0x1f   : > { %p1758_p10 = pnand %p1756_p9, %p1744_p13  ;;  %p1765_p0 = por %p1764_p12, %p1763_p2 }
  0x21   : > { %p1759_p1 = pneg %p1758_p10 }
  0x23   : > { %p1766_p6 = pnand %p1765_p0, %p1759_p1 }
  0x25   : > { %1769 = shalt.err (!%p1766_p6)
}
  0x26   : > { %s1902_s11 = smov 64   ;;  %s1903_s12 = smov 4  }
  0x27   : > { %1633 = dma.hbm_to_vmem [thread:$0]  (!%p1989_p11), %s2337_s1, 3072, %s1982_s25, [#allocation6], %s1902_s11, %s1902_s11, %s1903_s12  }
  0x28   : > { %s1770_s27 = scalar_lea.hbm %s2338_s2, 3072 }
  0x29   : > { %p1771_p2 = scmp.ne.s32.totalorder %s2338_s2, %s1770_s27  ;;  %p1777_p10 = scmp.lt.u32.totalorder %s1770_s27, %s2338_s2 }
  0x2b   : > { %p1773_p1 = pnand %p1771_p2, %p1744_p13 }
  0x2d   : > { %p1774_p6 = pneg %p1773_p1 }
  0x2f   : > { %p1779_p3 = pnand %p1777_p10, %p1774_p6 }
  0x31   : > { %1782 = shalt.err (!%p1779_p3)
}
  0x32   : > { %s1783_s25 = scalar_lea.vmem %s1993_s28, 3072  ;;  %p1791_p12 = scmp.lt.s32.totalorder %s1993_s28, %s1993_s28 }
  0x33   : > { %p1784_p5 = scmp.ne.s32.totalorder %s1993_s28, %s1783_s25  ;;  %p1792_p0 = scmp.lt.s32.totalorder %s1783_s25, %s1783_s25 }
  0x35   : > { %p1786_p7 = pnand %p1784_p5, %p1744_p13  ;;  %p1793_p2 = por %p1792_p0, %p1791_p12 }
  0x37   : > { %p1787_p9 = pneg %p1786_p7 }
  0x39   : > { %p1794_p1 = pnand %p1793_p2, %p1787_p9 }
  0x3b   : > { %1797 = shalt.err (!%p1794_p1)
}
  0x3c   : > { %1636 = dma.hbm_to_vmem [thread:$0]  (!%p1989_p11), %s2338_s2, 3072, %s1993_s28, [#allocation6], %s1902_s11, %s1902_s11, %s1903_s12  }
  0x3d   : > { %s2048_s9 = sadd.s32 1, %s1898_s18   ;;  %s28_s26 = sadd.s32 1, %s1894_s17 }
  0x3e   : > { %s25_s10 = ssub.s32 %s1898_s18, %s2048_s9  ;;  %p35_p13 = scmp.ne.s32.totalorder %s1894_s17, %s1890_s16 }
  0x3f   : > { %p26_p6 = scmp.eq.s32.totalorder %s25_s10, 0  ;;  %p36_p10 = scmp.eq.s32.totalorder %s1898_s18, 0 }
  0x40   : > { %p2348_p3 = scmp.eq.s32.totalorder %s1959_s19, 1  ;;  %p1647_p7 = scmp.lt.s32.totalorder %s1898_s18, 2 }
  0x41   : > { %s2064_s14 = scalar_select %p26_p6, %s1894_s17, %s28_s26  }
  0x42   : > { %p2058_p5 = por %p2348_p3, %p35_p13  ;;  %p37_p9 = por %p36_p10, %p35_p13 }
  0x43   : > { %s183_s20 = sand.u32 1, %s1894_s17   ;;  %s1332_s28 = smul.u32 640, %s1898_s18 }
  0x44   : > { %s2349_s13 = scalar_select %p2058_p5, 1, 0 }
  0x45   : > { %s1616_s24 = smul.u32 40, %s183_s20  ;;  %p2068_p11 = pnand %p1647_p7, %p37_p9 }
  0x46   : > { %s2075_s29 = scalar_lea.hbm %s2336_s0, %s1332_s28  ;;  %s2079_s6 = scalar_lea.sflag [#allocation3], %s183_s20 }
  0x47   : > { %s187_s30 = scalar_lea.vmem [#allocation2], %s1616_s24  ;;  %s1798_s25 = scalar_lea.hbm %s2075_s29, 640 }
  0x48   : > { %s194_s5 = sshll.u32 %s187_s30, 4  ;;  %p1799_p12 = scmp.ne.s32.totalorder %s2075_s29, %s1798_s25  ;;  %s2077_s5 = int_to_ptr.vmem [resolvable:$true] %s194_s5 }
  0x49   : > { %p1800_p0 = pneg %p2068_p11  ;;  %s1803_s26 = scalar_lea.hbm %s2336_s0, 1280 }
  0x4a   : > { %p1804_p13 = scmp.lt.u32.totalorder %s2075_s29, %s2336_s0  ;;  %p1805_p6 = scmp.lt.u32.totalorder %s1803_s26, %s1798_s25 }
  0x4b   : > { %p1801_p2 = pnand %p1800_p0, %p1799_p12  ;;  %p1807_p3 = scmp.lt.u32.totalorder %s1798_s25, %s2075_s29 }
  0x4c   : > { %p1806_p10 = por %p1805_p6, %p1804_p13 }
  0x4d   : > { %p1802_p1 = pneg %p1801_p2 }
  0x4e   : > { %p1808_p7 = por %p1807_p3, %p1806_p10 }
  0x50   : > { %p1809_p9 = pnand %p1808_p7, %p1802_p1 }
  0x52   : > { %1812 = shalt.err (!%p1809_p9)
}
  0x53   : > { %s1813_s20 = scalar_lea.vmem %s2077_s5, 640  ;;  %s1904_s24 = smov [#allocation2]  }
  0x54   : > { %p1814_p12 = scmp.ne.s32.totalorder %s2077_s5, %s1813_s20  ;;  %s1818_s12 = sshll.u32 %s1904_s24, 4  ;;  %s1819_s12 = int_to_ptr.vmem [resolvable:$false] %s1818_s12 }
  0x55   : > { %s1820_s27 = scalar_lea.vmem %s1819_s12, 1280  ;;  %p1821_p4 = scmp.lt.s32.totalorder %s2077_s5, %s1819_s12 }
  0x56   : > { %p1816_p2 = pnand %p1814_p12, %p1800_p0  ;;  %p1822_p13 = scmp.lt.s32.totalorder %s1820_s27, %s1813_s20 }
  0x58   : > { %p1817_p5 = pneg %p1816_p2  ;;  %p1823_p6 = por %p1822_p13, %p1821_p4 }
  0x5a   : > { %p1824_p10 = pnand %p1823_p6, %p1817_p5 }
  0x5c   : > { %1827 = shalt.err (!%p1824_p10)
}
  0x5d   : > { %s1905_s30 = smov 128   ;;  %s1906_s25 = smov 8  }
  0x5e   : > { %1640 = dma.hbm_to_vmem [thread:$0]  (!%p2068_p11), %s2075_s29, 640, %s2077_s5, %s2079_s6, %s1905_s30, %s1905_s30, %s1906_s25  }
  0x5f   : > { %206 = sbr.rel (%p1978_p8) target bundleno = 754 (0x2f2), region = 36  ;;  %s2110_s7 = sand.u32 (!%p1978_p8), 1, %s1890_s16  }
  0x60   : > { %s1617_s8 = smul.u32 (!%p1978_p8), 40, %s2110_s7  ;;  %s209_s26 = scalar_lea.sflag (!%p1978_p8), [#allocation3], %s2110_s7 }
  0x61   : > { %p2351_p4 = scmp.ne.s32.totalorder (!%p1978_p8), %s2344_s21, 0 }
  0x62   : > { %s2114_s10 = scalar_lea.vmem (!%p1978_p8), [#allocation2], %s1617_s8 }
  0x66   : > { %1873 = dma.done.wait (%p2351_p4), %s209_s26, 640  }
  0x67   : > { %1875 = vsyncadd (%p2351_p4), %s209_s26, 4294966656  ;;  %p2352_p5 = scmp.eq.s32.totalorder %s1959_s19, 0 }
  0x69   : > { %1877 = dma.done.wait (%p2352_p5), [#allocation6], 6144   ;;  %p2353_p8 = pmov %p2352_p5 }
  0x6a   : > { %v1907_v0 = vmov 0.0   ;;  %vm1908_vm0 = vmmov 0   ;;  %v1694_v1 = vld [vmem:[#allocation5 + $0x40] sm:$0xff]   ;;  %v1695_v2 = vld [vmem:[#allocation5 + $0x48] sm:$0xff]   ;;  %v1696_v3 = vld [vmem:[#allocation5 + $0x50] sm:$0xff]   ;;  %v666_v57 = vlaneseq  ;;  %vm1008_vm6 = vcmask 1046528  }
  0x6b   : > { %1879 = vsyncadd (%p2353_p8), [#allocation6], 4294961152  ;;  %1400 = vmatprep.subr.bf16.mxu0 %v1907_v0  ;;  %1416 = vmatprep.mubr.msk.bf16.mxu0 %vm1908_vm0, %v1907_v0  ;;  %v1697_v4 = vld [vmem:[#allocation5 + $0x58] sm:$0xff]   ;;  %v1698_v5 = vld [vmem:[#allocation5 + $0x60] sm:$0xff]   ;;  %vm753_vm7 = vsmask.f32 7424 }
  0x6c   : > { %1484 = vmatprep.subr.bf16.mxu1 %v1907_v0  ;;  %1500 = vmatprep.mubr.msk.bf16.mxu1 %vm1908_vm0, %v1907_v0  ;;  %v1699_v6 = vld [vmem:[#allocation5 + $0x68] sm:$0xff]   ;;  %v1700_v7 = vld [vmem:[#allocation5 + $0x70] sm:$0xff]   ;;  %v1701_v8 = vld [vmem:[#allocation5 + $0x78] sm:$0xff]   ;;  %v667_v58 = vshrl.u32 %v666_v57, 7  ;;  %s1274_s24 = sshll.u32 %s2110_s7, 5  ;;  %s1333_s30 = sshll.u32 %s1959_s19, 9 }
  0x6d   : > { %1401 = vmatpush3.bf16.msra.mxu0 %v1694_v1  ;;  %v257_v9 = vld [vmem:[%s2114_s10 + $0x1] sm:$0xff]  ;;  %v258_v10 = vld [vmem:[%s2114_s10 + $0x9] sm:$0xff]  ;;  %v259_v16 = vld [vmem:[%s2114_s10 + $0x11] sm:$0xff]  ;;  %s244_s12 = scalar_lea.vmem [#allocation8], %s1274_s24  ;;  %s2292_s26 = scalar_lea.hbm %s2340_s4, %s1333_s30 }
  0x6e   : > { %1402 = vmatprep.subr.bf16.mxu0 %v1907_v0  ;;  %v286_v11 = vpack.c.bf16 %v258_v10, %v257_v9  ;;  %v1718_v12 = vld [vmem:[#allocation7 + $0x40] sm:$0xff]   ;;  %v1719_v14 = vld [vmem:[#allocation7 + $0x48] sm:$0xff]   ;;  %v1704_v18 = vld [vmem:[#allocation5 + $0x10] sm:$0xff]   ;;  %vm672_vm1 = vcmp.eq.s32.totalorder %v667_v58, 0  ;;  %s1173_s27 = sshll.u32 %s244_s12, 4  ;;  %p2354_p0 = scmp.ne.s32.totalorder %s2349_s13, 0  ;;  %s2286_s27 = int_to_ptr.vmem [resolvable:$true] %s1173_s27 }
  0x6f   : > { %v1702_v13 = vld [vmem:[#allocation5] sm:$0xff]   ;;  %1485 = vmatpush3.bf16.msra.mxu1 %v1718_v12  ;;  %v1703_v15 = vld [vmem:[#allocation5 + $0x8] sm:$0xff]   ;;  %v1705_v20 = vld [vmem:[#allocation5 + $0x18] sm:$0xff]   ;;  %s1828_s21 = scalar_lea.vmem %s2286_s27, 512  ;;  %s1910_s19 = smov [#allocation8]  }
  0x70   : > { %v260_v17 = vld [vmem:[%s2114_s10 + $0x19] sm:$0xff]  ;;  %1486 = vmatprep.subr.bf16.mxu1 %v1907_v0  ;;  %v261_v21 = vld [vmem:[%s2114_s10 + $0x21] sm:$0x3f]  ;;  %v1706_v23 = vld [vmem:[#allocation5 + $0x20] sm:$0xff]   ;;  %p1829_p11 = scmp.ne.s32.totalorder %s2286_s27, %s1828_s21  ;;  %s1832_s23 = sshll.u32 %s1910_s19, 4  ;;  %s1833_s23 = int_to_ptr.vmem [resolvable:$false] %s1832_s23 }
  0x71   : > { %1403 = vmatpush3.bf16.msra.mxu0 %v1695_v2  ;;  %v287_v19 = vpack.c.bf16 %v260_v17, %v259_v16  ;;  %v288_v22 = vpack.c.bf16 %v261_v21, %v261_v21  ;;  %v1707_v24 = vld [vmem:[#allocation5 + $0x28] sm:$0xff]   ;;  %v1708_v25 = vld [vmem:[#allocation5 + $0x30] sm:$0xff]   ;;  %v1709_v26 = vld [vmem:[#allocation5 + $0x38] sm:$0xff]   ;;  %v669_v2 = vadd.s32 16, %v667_v58  ;;  %s1834_s11 = scalar_lea.vmem %s1833_s23, 1024  ;;  %p1835_p7 = scmp.lt.s32.totalorder %s2286_s27, %s1833_s23 }
  0x72   : > { %1404 = vmatprep.subr.bf16.mxu0 %v1907_v0  ;;  %v252_v27 = vld [vmem:[%s2114_s10] sm:$0xff]  ;;  %v253_v28 = vld [vmem:[%s2114_s10 + $0x8] sm:$0xff]  ;;  %v1711_v31 = vld [vmem:[#allocation5 + $0x88] sm:$0xff]   ;;  %p1830_p1 = pnand %p1829_p11, %p2354_p0  ;;  %p1836_p9 = scmp.lt.s32.totalorder %s1834_s11, %s1828_s21 }
  0x73   : > { %1487 = vmatpush3.bf16.msra.mxu1 %v1719_v14  ;;  %v267_v29 = vpack.c.bf16 %v253_v28, %v252_v27  ;;  %v1710_v30 = vld [vmem:[#allocation5 + $0x80] sm:$0xff]   ;;  %v255_v33 = vld [vmem:[%s2114_s10 + $0x18] sm:$0xff]  ;;  %v1713_v36 = vld [vmem:[#allocation5 + $0x98] sm:$0xff]   ;;  %vm679_vm2 = vcmp.eq.s32.totalorder %v669_v2, 17  ;;  %vm689_vm3 = vcmp.eq.s32.totalorder %v669_v2, 20 }
  0x74   : > { %1488 = vmatprep.subr.bf16.mxu1 %v1907_v0  ;;  %v254_v32 = vld [vmem:[%s2114_s10 + $0x10] sm:$0xff]  ;;  %v1712_v35 = vld [vmem:[#allocation5 + $0x90] sm:$0xff]   ;;  %v1717_v42 = vld [vmem:[#allocation5 + $0xb8] sm:$0xff]   ;;  %p1831_p3 = pneg %p1830_p1  ;;  %p1837_p12 = por %p1836_p9, %p1835_p7 }
  0x75   : > { %1405 = vmatpush3.bf16.msra.mxu0 %v1696_v3  ;;  %v268_v34 = vpack.c.bf16 %v255_v33, %v254_v32  ;;  %v256_v37 = vld [vmem:[%s2114_s10 + $0x20] sm:$0x3f]  ;;  %v1714_v39 = vld [vmem:[#allocation5 + $0xa0] sm:$0xff]   ;;  %v1715_v40 = vld [vmem:[#allocation5 + $0xa8] sm:$0xff]  }
  0x76   : > { %1406 = vmatprep.subr.bf16.mxu0 %v1907_v0  ;;  %v269_v38 = vpack.c.bf16 %v256_v37, %v256_v37  ;;  %v1716_v41 = vld [vmem:[#allocation5 + $0xb0] sm:$0xff]   ;;  %v2180_v44 = vld [vmem:[%s2114_s10 + $0xa] sm:$0xff]  ;;  %vm694_vm4 = vmor %vm679_vm2, %vm689_vm3  ;;  %p1838_p2 = pnand %p1837_p12, %p1831_p3 }
  0x77   : > { %v2177_v43 = vld [vmem:[%s2114_s10 + $0x2] sm:$0xff]  ;;  %v2188_v46 = vld [vmem:[%s2114_s10 + $0x12] sm:$0xff]  ;;  %v2191_v47 = vld [vmem:[%s2114_s10 + $0x1a] sm:$0xff] }
  0x78   : > { %v514_v45 = vpack.c.bf16 %v2180_v44, %v2177_v43  ;;  %v515_v48 = vpack.c.bf16 %v2191_v47, %v2188_v46  ;;  %v2198_v49 = vld [vmem:[%s2114_s10 + $0x22] sm:$0x3f]  ;;  %v1722_v53 = vld [vmem:[#allocation7 + $0x60] sm:$0xff]   ;;  %v1723_v54 = vld [vmem:[#allocation7 + $0x68] sm:$0xff]   ;;  %s1160_s10 = scalar_lea.sflag [#allocation4], %s2110_s7 }
  0x79   : > { %1407 = vmatpush3.bf16.msra.mxu0 %v1697_v4  ;;  %v516_v50 = vpack.c.bf16 %v2198_v49, %v2198_v49  ;;  %v1720_v51 = vld [vmem:[#allocation7 + $0x50] sm:$0xff]   ;;  %v1721_v52 = vld [vmem:[#allocation7 + $0x58] sm:$0xff]  }
  0x7a   : > { %1408 = vmatprep.subr.bf16.mxu0 %v1907_v0  ;;  %1489 = vmatpush3.bf16.msra.mxu1 %v1720_v51  ;;  %v1724_v55 = vld [vmem:[#allocation7 + $0x70] sm:$0xff]   ;;  %v1725_v56 = vld [vmem:[#allocation7 + $0x78] sm:$0xff]  }
  0x7b   : > { %1490 = vmatprep.subr.bf16.mxu1 %v1907_v0  ;;  %v1299_v59 = vld [vmem:[%s2339_s3] ss:$0 sm:$0xff]  ;;  %v1300_v60 = vld [vmem:[%s2339_s3 + $0x1] ss:$0 sm:$0xff] }
  0x7d   : > { %1409 = vmatpush3.bf16.msra.mxu0 %v1698_v5 }
  0x7e   : > { %1410 = vmatprep.subr.bf16.mxu0 %v1907_v0  ;;  %1491 = vmatpush3.bf16.msra.mxu1 %v1721_v52 }
  0x7f   : > { %1492 = vmatprep.subr.bf16.mxu1 %v1907_v0 }
  0x81   : > { %1411 = vmatpush3.bf16.msra.mxu0 %v1699_v6  ;;  %v1909_v6 = vmov 1.0  }
  0x82   : > { %1412 = vmatprep.subr.bf16.mxu0 %v1907_v0  ;;  %1493 = vmatpush3.bf16.msra.mxu1 %v1722_v53  ;;  %v1727_v53 = vld [vmem:[#allocation7 + $0x8] sm:$0xff]  }
  0x83   : > { %1494 = vmatprep.subr.bf16.mxu1 %v1907_v0 }
  0x85   : > { %1413 = vmatpush3.bf16.msra.mxu0 %v1700_v7  ;;  %v707_v7 = vsel %vm672_vm1, 0.0, %v1909_v6 }
  0x86   : > { %1414 = vmatprep.subr.bf16.mxu0 %v1907_v0  ;;  %1495 = vmatpush3.bf16.msra.mxu1 %v1723_v54 }
  0x87   : > { %1496 = vmatprep.subr.bf16.mxu1 %v1907_v0 }
  0x89   : > { %1415 = vmatpush3.bf16.msra.mxu0 %v1701_v8 }
  0x8a   : > { %1428 = vmatprep.subr.bf16.mxu0 %v1907_v0  ;;  %1497 = vmatpush3.bf16.msra.mxu1 %v1724_v55 }
  0x8b   : > { %1498 = vmatprep.subr.bf16.mxu1 %v1907_v0 }
  0x8c   : > { %1417 = vmatmul.mubr.bf16.vlgmr.msra.gmra.mrb[0].mxu0 %v286_v11 }
  0x8d   : > { %1429 = vmatpush3.bf16.msra.mxu0 %v1702_v13  ;;  %1420 = vmatprep.mubr.msk.bf16.mxu0 %vm1908_vm0, %v1907_v0 }
  0x8e   : > { %1430 = vmatprep.subr.bf16.mxu0 %v1907_v0  ;;  %1499 = vmatpush3.bf16.msra.mxu1 %v1725_v56 }
  0x8f   : > { %1512 = vmatprep.subr.bf16.mxu1 %v1907_v0 }
  0x91   : > { %1431 = vmatpush3.bf16.msra.mxu0 %v1703_v15 }
  0x92   : > { %1432 = vmatprep.subr.bf16.mxu0 %v1907_v0 }
  0x94   : > { %1421 = vmatmul.mubr.bf16.gmra.mrb[4].mxu0 %v287_v19 }
  0x95   : > { %1433 = vmatpush3.bf16.msra.mxu0 %v1704_v18  ;;  %1424 = vmatprep.mubr.msk.bf16.mxu0 %vm1908_vm0, %v1907_v0 }
  0x96   : > { %1434 = vmatprep.subr.bf16.mxu0 %v1907_v0 }
  0x99   : > { %1435 = vmatpush3.bf16.msra.mxu0 %v1705_v20  ;;  %v709_v20 = vsel %vm694_vm4, 0.0, %v1909_v6 }
  0x9a   : > { %1436 = vmatprep.subr.bf16.mxu0 %v1907_v0 }
  0x9c   : > { %1425 = vmatmul.mubr.bf16.gmra.mrb[8].mxu0 %v288_v22 }
  0x9d   : > { %1437 = vmatpush3.bf16.msra.mxu0 %v1706_v23  ;;  %1444 = vmatprep.mubr.msk.bf16.mxu0 %vm1908_vm0, %v1907_v0  ;;  %v671_v23 = vadd.s32 32, %v667_v58 }
  0x9e   : > { %1438 = vmatprep.subr.bf16.mxu0 %v1907_v0 }
  0x9f   : > { %vm701_vm5 = vcmp.eq.s32.totalorder %v671_v23, 37 }
  0xa1   : > { %1439 = vmatpush3.bf16.msra.mxu0 %v1707_v24 }
  0xa2   : > { %1440 = vmatprep.subr.bf16.mxu0 %v1907_v0 }
  0xa5   : > { %1441 = vmatpush3.bf16.msra.mxu0 %v1708_v25 }
  0xa6   : > { %1442 = vmatprep.subr.bf16.mxu0 %v1907_v0 }
  0xa9   : > { %1443 = vmatpush3.bf16.msra.mxu0 %v1709_v26 }
  0xaa   : > { %1456 = vmatprep.subr.bf16.mxu0 %v1907_v0 }
  0xac   : > { %1445 = vmatmul.mubr.bf16.vlgmr.msra.gmra.mrb[0].mxu0 %v267_v29 }
  0xad   : > { %1457 = vmatpush3.bf16.msra.mxu0 %v1710_v30  ;;  %1448 = vmatprep.mubr.msk.bf16.mxu0 %vm1908_vm0, %v1907_v0 }
  0xae   : > { %1458 = vmatprep.subr.bf16.mxu0 %v1907_v0 }
  0xb1   : > { %1459 = vmatpush3.bf16.msra.mxu0 %v1711_v31 }
  0xb2   : > { %1460 = vmatprep.subr.bf16.mxu0 %v1907_v0 }
  0xb4   : > { %1449 = vmatmul.mubr.bf16.gmra.mrb[4].mxu0 %v268_v34 }
  0xb5   : > { %1461 = vmatpush3.bf16.msra.mxu0 %v1712_v35  ;;  %1452 = vmatprep.mubr.msk.bf16.mxu0 %vm1908_vm0, %v1907_v0 }
  0xb6   : > { %1462 = vmatprep.subr.bf16.mxu0 %v1907_v0 }
  0xb9   : > { %1463 = vmatpush3.bf16.msra.mxu0 %v1713_v36 }
  0xba   : > { %1464 = vmatprep.subr.bf16.mxu0 %v1907_v0 }
  0xbc   : > { %1453 = vmatmul.mubr.bf16.gmra.mrb[8].mxu0 %v269_v38 }
  0xbd   : > { %1465 = vmatpush3.bf16.msra.mxu0 %v1714_v39  ;;  %1472 = vmatprep.mubr.msk.bf16.mxu0 %vm1908_vm0, %v1907_v0  ;;  %v711_v39 = vsel %vm701_vm5, 0.0, %v1909_v6  ;;  %v1734_v6 = vld [vmem:[#allocation7 + $0x80] sm:$0xff]  }
  0xbe   : > { %1466 = vmatprep.subr.bf16.mxu0 %v1907_v0 }
  0xc1   : > { %1467 = vmatpush3.bf16.msra.mxu0 %v1715_v40 }
  0xc2   : > { %1468 = vmatprep.subr.bf16.mxu0 %v1907_v0 }
  0xc5   : > { %1469 = vmatpush3.bf16.msra.mxu0 %v1716_v41 }
  0xc6   : > { %1470 = vmatprep.subr.bf16.mxu0 %v1907_v0 }
  0xc9   : > { %1471 = vmatpush3.bf16.msra.mxu0 %v1717_v42 }
  0xcc   : > { %1473 = vmatmul.mubr.bf16.vlgmr.msra.gmra.mrb[0].mxu0 %v514_v45  ;;  %v1726_v45 = vld [vmem:[#allocation7] sm:$0xff]  }
  0xcd   : > { %1476 = vmatprep.mubr.msk.bf16.mxu0 %vm1908_vm0, %v1907_v0 }
  0xd4   : > { %1477 = vmatmul.mubr.bf16.gmra.mrb[4].mxu0 %v515_v48 }
  0xd5   : > { %1480 = vmatprep.mubr.msk.bf16.mxu0 %vm1908_vm0, %v1907_v0 }
  0xdc   : > { %1481 = vmatmul.mubr.bf16.gmra.mrb[8].mxu0 %v516_v50 }
 0x19f   : > { %v616_v61 = vpop.f32.mrb[0].mxu0 }
 0x1a0   : > { %v647_v62 = vmul.f32 %v1299_v59, %v616_v61  ;;  %v1474_v63 = vpop.f32.mrb[1].mxu0 }
 0x1a1   : > { %v619_v1 = vpop.f32.mrb[2].mxu0 }
 0x1a2   : > { %v656_v3 = vadd.f32 %v1300_v60, %v647_v62  ;;  %v648_v4 = vmul.f32 %v1299_v59, %v619_v1  ;;  %v1475_v5 = vpop.f32.mrb[3].mxu0  ;;  %v1729_v62 = vld [vmem:[#allocation7 + $0x18] sm:$0xff]   ;;  %v1730_v1 = vld [vmem:[#allocation7 + $0x20] sm:$0xff]  }
 0x1a3   : > { %v1733_v5 = vld [vmem:[#allocation7 + $0x38] sm:$0xff]  }
 0x1a4   : > { %v661_v8 = vmax.f32 %v656_v3, 0.0  ;;  %v657_v9 = vadd.f32 %v1300_v60, %v648_v4  ;;  %v1731_v3 = vld [vmem:[#allocation7 + $0x28] sm:$0xff]   ;;  %v1732_v4 = vld [vmem:[#allocation7 + $0x30] sm:$0xff]  }
 0x1a6   : > { %v712_v10 = vmul.f32 %v707_v7, %v661_v8  ;;  %v662_v11 = vmax.f32 %v657_v9, 0.0  ;;  %v1735_v7 = vld [vmem:[#allocation7 + $0x88] sm:$0xff]   ;;  %v1736_v8 = vld [vmem:[#allocation7 + $0x90] sm:$0xff]   ;;  %v1737_v9 = vld [vmem:[#allocation7 + $0x98] sm:$0xff]  }
 0x1a7   : > { %v624_v12 = vpop.f32.mrb[4].mxu0 }
 0x1a8   : > { %v2214_v13 = vpack.c.bf16 %v662_v11, %v712_v10  ;;  %v649_v14 = vmul.f32 %v1299_v59, %v624_v12  ;;  %v1478_v15 = vpop.f32.mrb[5].mxu0  ;;  %v1738_v10 = vld [vmem:[#allocation7 + $0xa0] sm:$0xff]   ;;  %v1739_v11 = vld [vmem:[#allocation7 + $0xa8] sm:$0xff]   ;;  %v1740_v12 = vld [vmem:[#allocation7 + $0xb0] sm:$0xff]  }
 0x1a9   : > { %v627_v16 = vpop.f32.mrb[6].mxu0  ;;  %v1326_v15 = vld [vmem:[%s2339_s3 + $0x3] ss:$0 sm:$0xff] }
 0x1aa   : > { %v658_v17 = vadd.f32 %v1300_v60, %v649_v14  ;;  %v650_v18 = vmul.f32 %v1299_v59, %v627_v16  ;;  %v1479_v19 = vpop.f32.mrb[7].mxu0  ;;  %v757_v24 = vshll.u32 %v2214_v13, 16  ;;  %v755_v33 = vshrl.u32 %v2214_v13, 16  ;;  %v1325_v14 = vld [vmem:[%s2339_s3 + $0x2] ss:$0 sm:$0xff] }
 0x1ab   : > { %v1009_v37 = vrot.slane %v2214_v13, 1 }
 0x1ac   : > { %v663_v21 = vmax.f32 %v658_v17, 0.0  ;;  %v659_v22 = vadd.f32 %v1300_v60, %v650_v18  ;;  %v759_v31 = vrot.slane %v757_v24, 1 }
 0x1ae   : > { %v714_v25 = vmul.f32 %v709_v20, %v663_v21  ;;  %v664_v26 = vmax.f32 %v659_v22, 0.0  ;;  %v760_v41 = vor.u32 %v759_v31, %v755_v33 }
 0x1af   : > { %v632_v27 = vpop.f32.mrb[8].mxu0 }
 0x1b0   : > { %v2217_v28 = vpack.c.bf16 %v664_v26, %v714_v25  ;;  %v651_v29 = vmul.f32 %v1299_v59, %v632_v27  ;;  %v1482_v30 = vpop.f32.mrb[9].mxu0  ;;  %v1728_v59 = vld [vmem:[#allocation7 + $0x10] sm:$0xff]  }
 0x1b1   : > { %v635_v32 = vpop.f32.mrb[10].mxu0 }
 0x1b2   : > { %v660_v34 = vadd.f32 %v1300_v60, %v651_v29  ;;  %v1483_v35 = vpop.f32.mrb[11].mxu0  ;;  %v762_v36 = vshll.u32 %v2217_v28, 16  ;;  %v1010_v38 = vrot.slane %v2217_v28, 1  ;;  %v766_v54 = vshrl.u32 %v2217_v28, 16 }
 0x1b4   : > { %v665_v40 = vmax.f32 %v660_v34, 0.0  ;;  %v764_v42 = vrot.slane %v762_v36, 1  ;;  %v2224_v48 = vsel %vm1008_vm6, %v1009_v37, %v1010_v38 }
 0x1b6   : > { %v716_v50 = vmul.f32 %v711_v39, %v665_v40  ;;  %v765_v51 = vsel %vm753_vm7, %v760_v41, %v764_v42  ;;  %v768_v57 = vor.u32 %v766_v54, %v764_v42 }
 0x1b7   : > { %1501 = vmatmul.mubr.bf16.vlgmr.msra.gmra.mrb[0].mxu1 %v765_v51 }
 0x1b8   : > { %v2227_v52 = vpack.c.bf16 %v716_v50, %v716_v50  ;;  %1513 = vmatpush3.bf16.msra.mxu1 %v1726_v45  ;;  %1504 = vmatprep.mubr.msk.bf16.mxu1 %vm1908_vm0, %v1907_v0 }
 0x1b9   : > { %1514 = vmatprep.subr.bf16.mxu1 %v1907_v0 }
 0x1ba   : > { %v770_v55 = vshll.u32 %v2227_v52, 16  ;;  %v1012_v56 = vrot.slane %v2227_v52, 1  ;;  %v774_v63 = vshrl.u32 %v2227_v52, 16 }
 0x1bc   : > { %1515 = vmatpush3.bf16.msra.mxu1 %v1727_v53  ;;  %v772_v58 = vrot.slane %v770_v55, 1  ;;  %v1013_v60 = vsel %vm1008_vm6, %v1010_v38, %v1012_v56 }
 0x1bd   : > { %1516 = vmatprep.subr.bf16.mxu1 %v1907_v0 }
 0x1be   : > { %v773_v61 = vsel %vm753_vm7, %v768_v57, %v772_v58  ;;  %v776_v2 = vor.u32 %v774_v63, %v772_v58 }
 0x1bf   : > { %1505 = vmatmul.mubr.bf16.gmra.mrb[4].mxu1 %v773_v61 }
 0x1c0   : > { %1517 = vmatpush3.bf16.msra.mxu1 %v1728_v59  ;;  %1508 = vmatprep.mubr.msk.bf16.mxu1 %vm1908_vm0, %v1907_v0 }
 0x1c1   : > { %1518 = vmatprep.subr.bf16.mxu1 %v1907_v0 }
 0x1c4   : > { %1519 = vmatpush3.bf16.msra.mxu1 %v1729_v62 }
 0x1c5   : > { %1520 = vmatprep.subr.bf16.mxu1 %v1907_v0 }
 0x1c7   : > { %1509 = vmatmul.mubr.bf16.gmra.mrb[8].mxu1 %v776_v2 }
 0x1c8   : > { %1521 = vmatpush3.bf16.msra.mxu1 %v1730_v1  ;;  %1528 = vmatprep.mubr.msk.bf16.mxu1 %vm1908_vm0, %v1907_v0 }
 0x1c9   : > { %1522 = vmatprep.subr.bf16.mxu1 %v1907_v0 }
 0x1cc   : > { %1523 = vmatpush3.bf16.msra.mxu1 %v1731_v3 }
 0x1cd   : > { %1524 = vmatprep.subr.bf16.mxu1 %v1907_v0 }
 0x1d0   : > { %1525 = vmatpush3.bf16.msra.mxu1 %v1732_v4 }
 0x1d1   : > { %1526 = vmatprep.subr.bf16.mxu1 %v1907_v0 }
 0x1d4   : > { %1527 = vmatpush3.bf16.msra.mxu1 %v1733_v5 }
 0x1d5   : > { %1540 = vmatprep.subr.bf16.mxu1 %v1907_v0 }
 0x1d7   : > { %1529 = vmatmul.mubr.bf16.vlgmr.msra.gmra.mrb[0].mxu1 %v2214_v13  ;;  %v1741_v13 = vld [vmem:[#allocation7 + $0xb8] sm:$0xff]  }
 0x1d8   : > { %1541 = vmatpush3.bf16.msra.mxu1 %v1734_v6  ;;  %1532 = vmatprep.mubr.msk.bf16.mxu1 %vm1908_vm0, %v1907_v0 }
 0x1d9   : > { %1542 = vmatprep.subr.bf16.mxu1 %v1907_v0 }
 0x1dc   : > { %1543 = vmatpush3.bf16.msra.mxu1 %v1735_v7 }
 0x1dd   : > { %1544 = vmatprep.subr.bf16.mxu1 %v1907_v0 }
 0x1df   : > { %1533 = vmatmul.mubr.bf16.gmra.mrb[4].mxu1 %v2217_v28 }
 0x1e0   : > { %1545 = vmatpush3.bf16.msra.mxu1 %v1736_v8  ;;  %1536 = vmatprep.mubr.msk.bf16.mxu1 %vm1908_vm0, %v1907_v0 }
 0x1e1   : > { %1546 = vmatprep.subr.bf16.mxu1 %v1907_v0 }
 0x1e4   : > { %1547 = vmatpush3.bf16.msra.mxu1 %v1737_v9 }
 0x1e5   : > { %1548 = vmatprep.subr.bf16.mxu1 %v1907_v0 }
 0x1e7   : > { %1537 = vmatmul.mubr.bf16.gmra.mrb[8].mxu1 %v2227_v52 }
 0x1e8   : > { %1549 = vmatpush3.bf16.msra.mxu1 %v1738_v10  ;;  %1556 = vmatprep.mubr.msk.bf16.mxu1 %vm1908_vm0, %v1907_v0 }
 0x1e9   : > { %1550 = vmatprep.subr.bf16.mxu1 %v1907_v0 }
 0x1ec   : > { %1551 = vmatpush3.bf16.msra.mxu1 %v1739_v11 }
 0x1ed   : > { %1552 = vmatprep.subr.bf16.mxu1 %v1907_v0 }
 0x1f0   : > { %1553 = vmatpush3.bf16.msra.mxu1 %v1740_v12 }
 0x1f1   : > { %1554 = vmatprep.subr.bf16.mxu1 %v1907_v0 }
 0x1f4   : > { %1555 = vmatpush3.bf16.msra.mxu1 %v1741_v13 }
 0x1f7   : > { %1557 = vmatmul.mubr.bf16.vlgmr.msra.gmra.mrb[0].mxu1 %v2224_v48 }
 0x1f8   : > { %1560 = vmatprep.mubr.msk.bf16.mxu1 %vm1908_vm0, %v1907_v0 }
 0x1ff   : > { %1561 = vmatmul.mubr.bf16.gmra.mrb[4].mxu1 %v1013_v60 }
 0x200   : > { %1564 = vmatprep.mubr.msk.bf16.mxu1 %vm1908_vm0, %v1907_v0 }
 0x207   : > { %1565 = vmatmul.mubr.bf16.gmra.mrb[8].mxu1 %v1012_v56 }
 0x2ca   : > { %v1099_v16 = vpop.f32.mrb[0].mxu1 }
 0x2cb   : > { %v1130_v17 = vmul.f32 %v1325_v14, %v1099_v16  ;;  %v1558_v18 = vpop.f32.mrb[1].mxu1 }
 0x2cc   : > { %v1102_v19 = vpop.f32.mrb[2].mxu1 }
 0x2cd   : > { %v1139_v20 = vadd.f32 %v1326_v15, %v1130_v17  ;;  %v1131_v21 = vmul.f32 %v1325_v14, %v1102_v19  ;;  %v1559_v22 = vpop.f32.mrb[3].mxu1 }
 0x2cf   : > { %v1144_v0 = vadd.f32 %v1139_v20, %v2177_v43  ;;  %v1140_v23 = vadd.f32 %v1326_v15, %v1131_v21 }
 0x2d1   : > { %v1149_v24 = vmax.f32 %v1144_v0, 0.0  ;;  %v1145_v25 = vadd.f32 %v1140_v23, %v2180_v44 }
 0x2d2   : > { %v1107_v26 = vpop.f32.mrb[4].mxu1 }
 0x2d3   : > { %1154 = vst [vmem:[%s244_s12] sm:$0xff] %v1149_v24  ;;  %v1150_v27 = vmax.f32 %v1145_v25, 0.0  ;;  %v1132_v28 = vmul.f32 %v1325_v14, %v1107_v26  ;;  %v1562_v29 = vpop.f32.mrb[5].mxu1 }
 0x2d4   : > { %v1110_v30 = vpop.f32.mrb[6].mxu1 }
 0x2d5   : > { %1155 = vst [vmem:[%s244_s12 + $0x8] sm:$0xff] %v1150_v27  ;;  %v1141_v31 = vadd.f32 %v1326_v15, %v1132_v28  ;;  %v1133_v32 = vmul.f32 %v1325_v14, %v1110_v30  ;;  %v1563_v33 = vpop.f32.mrb[7].mxu1 }
 0x2d7   : > { %v1146_v34 = vadd.f32 %v1141_v31, %v2188_v46  ;;  %v1142_v35 = vadd.f32 %v1326_v15, %v1133_v32 }
 0x2d9   : > { %v1151_v43 = vmax.f32 %v1146_v34, 0.0  ;;  %v1147_v36 = vadd.f32 %v1142_v35, %v2191_v47 }
 0x2da   : > { %v1115_v37 = vpop.f32.mrb[8].mxu1 }
 0x2db   : > { %1156 = vst [vmem:[%s244_s12 + $0xc] sm:$0xf0] %v1151_v43  ;;  %v1152_v44 = vmax.f32 %v1147_v36, 0.0  ;;  %v1134_v38 = vmul.f32 %v1325_v14, %v1115_v37  ;;  %v1566_v39 = vpop.f32.mrb[9].mxu1 }
 0x2dc   : > { %v1118_v40 = vpop.f32.mrb[10].mxu1 }
 0x2dd   : > { %1157 = vst [vmem:[%s244_s12 + $0x14] sm:$0xff] %v1152_v44  ;;  %v1143_v41 = vadd.f32 %v1326_v15, %v1134_v38  ;;  %v1567_v42 = vpop.f32.mrb[11].mxu1 }
 0x2df   : > { %v1148_v46 = vadd.f32 %v1143_v41, %v2198_v49 }
 0x2e1   : > { %v1153_v47 = vmax.f32 %v1148_v46, 0.0 }
 0x2e3   : > { %1158 = vst [vmem:[%s244_s12 + $0x1c] sm:$0xf] %v1153_v47 }
 0x2e4   : > { %1841 = shalt.err (!%p1838_p2)
}
 0x2e5   : > { %s1842_s29 = scalar_lea.hbm %s2292_s26, 512  ;;  %s1846_s28 = scalar_lea.hbm %s2340_s4, 1024 }
 0x2e6   : > { %p1843_p13 = scmp.ne.s32.totalorder %s2292_s26, %s1842_s29  ;;  %p1847_p4 = scmp.lt.u32.totalorder %s2292_s26, %s2340_s4 }
 0x2e7   : > { %p1848_p5 = scmp.lt.u32.totalorder %s1846_s28, %s1842_s29  ;;  %p1850_p11 = scmp.lt.u32.totalorder %s1842_s29, %s2292_s26 }
 0x2e8   : > { %p1844_p6 = pnand %p1843_p13, %p2354_p0 }
 0x2e9   : > { %p1849_p8 = por %p1848_p5, %p1847_p4 }
 0x2ea   : > { %p1845_p10 = pneg %p1844_p6 }
 0x2eb   : > { %p1851_p1 = por %p1850_p11, %p1849_p8 }
 0x2ed   : > { %p1852_p3 = pnand %p1851_p1, %p1845_p10 }
 0x2ef   : > { %1855 = shalt.err (!%p1852_p3)
}
 0x2f0   : > { %s1911_s12 = smov 128   ;;  %s1912_s30 = smov 8  }
 0x2f1   : > { %1628 = dma.vmem_to_hbm [thread:$0]  (%p2354_p0), %s2286_s27, 512, %s2292_s26, %s1160_s10, %s1911_s12, %s1911_s12, %s1912_s30  }
 0x2f2 PF: > { %s1188_s25 = sand.u32 1, %s1886_s15   ;;  %p2355_p7 = scmp.ne.s32.totalorder %s2345_s22, 0 }
 0x2f3   : > { %p2356_p9 = scmp.ge.s32.totalorder %s1898_s18, 2  ;;  %s1189_s8 = scalar_lea.sflag [#allocation4], %s1188_s25 }
 0x2f5   : > { %p1642_p12 = pnand %p2356_p9, %p2355_p7 }
 0x2f7   : > { %1881 = dma.done.wait (!%p1642_p12), %s1189_s8, 512  }
 0x2f8   : > { %1883 = vsyncadd (!%p1642_p12), %s1189_s8, 4294966784  ;;  %p18_p2 = scmp.ge.s32.totalorder %s2048_s9, 4   ;;  %s2357_s15 = smov %s1890_s16 }
 0x2f9   : > { %s2358_s16 = smov %s1894_s17  ;;  %s2359_s17 = smov %s2064_s14 }
 0x2fa   : > { %s2360_s18 = smov %s2048_s9  ;;  %20 = sbr.rel (!%p18_p2) target bundleno = 6 (0x6), region = 93 }
 0x301   :  { %1194 = vsyncpa [#allocation3], 1 }
 0x302   :  { %1196 = vsyncpa [#allocation3 + $0x1], 1 }
 0x303   :  { %1197 = vsyncpa [#allocation6], 1 }
 0x304   :  { %1198 = vsyncpa [#allocation4], 1 }
 0x305   :  { %1200 = vsyncpa [#allocation4 + $0x1], 1 }

// kernel: tpu_custom_call.1
= control target key start
LH: loop header
LB: loop body
LE: loop exit
PB: predicated region body
PF: predicated region fallthrough
CT: control target
= control target key end

     0   :  { %9 = vsyncpa [#allocation3], 0  ;;  %s2336_s0 = inlined_call_operand.hbm [shape: f32[80,128], index: 0, kind: input, shape index: {}]   ;;  %s2337_s1 = inlined_call_operand.hbm [shape: bf16[3,128,128], index: 1, kind: input, shape index: {}]   ;;  %s2338_s2 = inlined_call_operand.hbm [shape: bf16[3,128,128], index: 2, kind: input, shape index: {}]   ;;  %s2339_s3 = inlined_call_operand.vmem [shape: f32[4,128], index: 3, kind: input, shape index: {}]   ;;  %s2340_s4 = inlined_call_operand.hbm [shape: f32[64,128], index: 4, kind: output, shape index: {}]  }
   0x1   :  { %11 = vsyncpa [#allocation3 + $0x1], 0 }
   0x2   :  { %12 = vsyncpa [#allocation6], 0 }
   0x3   :  { %13 = vsyncpa [#allocation4], 0 }
   0x4   :  { %15 = vsyncpa [#allocation4 + $0x1], 0  ;;  %s1938_s15 = smov 0   ;;  %s1940_s16 = smov 0  }
   0x5   :  { %s1942_s17 = smov 0   ;;  %s1944_s18 = smov 0  }
   0x6 LB: > { %s1959_s19 = sadd.s32 4294967295, %s1898_s18   ;;  %s1265_s20 = sadd.s32 4294967294, %s1898_s18   ;;  %s1898_s18 = sphi %s1944_s18, %s2360_s18   ;;  %s1894_s17 = sphi %s1942_s17, %s2359_s17   ;;  %s1890_s16 = sphi %s1940_s16, %s2358_s16   ;;  %s1886_s15 = sphi %s1938_s15, %s2357_s15  }
   0x7   : > { %p41_p0 = scmp.ne.s32.totalorder %s1890_s16, %s1886_s15  ;;  %p2341_p1 = scmp.eq.s32.totalorder %s1959_s19, 0 }
   0x8   : > { %p134_p3 = scmp.eq.s32.totalorder %s1265_s20, 1  ;;  %p1266_p5 = scmp.ge.s32.totalorder %s1898_s18, 1 }
   0x9   : > { %p1968_p4 = por %p2341_p1, %p41_p0  ;;  %p141_p7 = scmp.lt.s32.totalorder %s1898_s18, 3 }
   0xa   : > { %p1973_p6 = por %p134_p3, %p41_p0  ;;  %s1900_s24 = smov [#allocation5]  }
   0xb   : > { %s2344_s21 = scalar_select %p1968_p4, 1, 0 }
   0xc   : > { %s2345_s22 = scalar_select %p1973_p6, 1, 0 }
   0xd   : > { %p1978_p8 = pnand %p1266_p5, %p141_p7  ;;  %s153_s25 = sshll.u32 %s1900_s24, 4  ;;  %s1982_s25 = int_to_ptr.vmem [resolvable:$true] %s153_s25 }
   0xe   : > { %s1901_s27 = smov [#allocation7]   ;;  %s1742_s5 = scalar_lea.hbm %s2337_s1, 3072 }
   0xf   : > { %p1630_p9 = pneg %p1978_p8  ;;  %s166_s28 = sshll.u32 %s1901_s27, 4  ;;  %s1993_s28 = int_to_ptr.vmem [resolvable:$true] %s166_s28 }
  0x10   : > { %p1743_p12 = scmp.ne.s32.totalorder %s2337_s1, %s1742_s5  ;;  %p1749_p5 = scmp.lt.u32.totalorder %s1742_s5, %s2337_s1 }
  0x11   : > { %p1989_p11 = pnand %p1630_p9, %p2341_p1 }
  0x13   : > { %p1744_p13 = pneg %p1989_p11 }
  0x15   : > { %p1745_p0 = pnand %p1744_p13, %p1743_p12 }
  0x17   : > { %p1746_p3 = pneg %p1745_p0 }
  0x19   : > { %p1751_p7 = pnand %p1749_p5, %p1746_p3 }
  0x1b   : > { %1754 = shalt.err (!%p1751_p7)
}
  0x1c   : > { %s1755_s10 = scalar_lea.vmem %s1982_s25, 3072  ;;  %p1763_p2 = scmp.lt.s32.totalorder %s1982_s25, %s1982_s25 }
  0x1d   : > { %p1756_p9 = scmp.ne.s32.totalorder %s1982_s25, %s1755_s10  ;;  %p1764_p12 = scmp.lt.s32.totalorder %s1755_s10, %s1755_s10 }
  0x1f   : > { %p1758_p10 = pnand %p1756_p9, %p1744_p13  ;;  %p1765_p0 = por %p1764_p12, %p1763_p2 }
  0x21   : > { %p1759_p1 = pneg %p1758_p10 }
  0x23   : > { %p1766_p6 = pnand %p1765_p0, %p1759_p1 }
  0x25   : > { %1769 = shalt.err (!%p1766_p6)
}
  0x26   : > { %s1902_s11 = smov 64   ;;  %s1903_s12 = smov 4  }
  0x27   : > { %1633 = dma.hbm_to_vmem [thread:$0]  (!%p1989_p11), %s2337_s1, 3072, %s1982_s25, [#allocation6], %s1902_s11, %s1902_s11, %s1903_s12  }
  0x28   : > { %s1770_s27 = scalar_lea.hbm %s2338_s2, 3072 }
  0x29   : > { %p1771_p2 = scmp.ne.s32.totalorder %s2338_s2, %s1770_s27  ;;  %p1777_p10 = scmp.lt.u32.totalorder %s1770_s27, %s2338_s2 }
  0x2b   : > { %p1773_p1 = pnand %p1771_p2, %p1744_p13 }
  0x2d   : > { %p1774_p6 = pneg %p1773_p1 }
  0x2f   : > { %p1779_p3 = pnand %p1777_p10, %p1774_p6 }
  0x31   : > { %1782 = shalt.err (!%p1779_p3)
}
  0x32   : > { %s1783_s25 = scalar_lea.vmem %s1993_s28, 3072  ;;  %p1791_p12 = scmp.lt.s32.totalorder %s1993_s28, %s1993_s28 }
  0x33   : > { %p1784_p5 = scmp.ne.s32.totalorder %s1993_s28, %s1783_s25  ;;  %p1792_p0 = scmp.lt.s32.totalorder %s1783_s25, %s1783_s25 }
  0x35   : > { %p1786_p7 = pnand %p1784_p5, %p1744_p13  ;;  %p1793_p2 = por %p1792_p0, %p1791_p12 }
  0x37   : > { %p1787_p9 = pneg %p1786_p7 }
  0x39   : > { %p1794_p1 = pnand %p1793_p2, %p1787_p9 }
  0x3b   : > { %1797 = shalt.err (!%p1794_p1)
}
  0x3c   : > { %1636 = dma.hbm_to_vmem [thread:$0]  (!%p1989_p11), %s2338_s2, 3072, %s1993_s28, [#allocation6], %s1902_s11, %s1902_s11, %s1903_s12  }
  0x3d   : > { %s2048_s9 = sadd.s32 1, %s1898_s18   ;;  %s28_s26 = sadd.s32 1, %s1894_s17 }
  0x3e   : > { %s25_s10 = ssub.s32 %s1898_s18, %s2048_s9  ;;  %p35_p13 = scmp.ne.s32.totalorder %s1894_s17, %s1890_s16 }
  0x3f   : > { %p26_p6 = scmp.eq.s32.totalorder %s25_s10, 0  ;;  %p36_p10 = scmp.eq.s32.totalorder %s1898_s18, 0 }
  0x40   : > { %p2348_p3 = scmp.eq.s32.totalorder %s1959_s19, 1  ;;  %p1647_p7 = scmp.lt.s32.totalorder %s1898_s18, 2 }
  0x41   : > { %s2064_s14 = scalar_select %p26_p6, %s1894_s17, %s28_s26  }
  0x42   : > { %p2058_p5 = por %p2348_p3, %p35_p13  ;;  %p37_p9 = por %p36_p10, %p35_p13 }
  0x43   : > { %s183_s20 = sand.u32 1, %s1894_s17   ;;  %s1332_s28 = smul.u32 640, %s1898_s18 }
  0x44   : > { %s2349_s13 = scalar_select %p2058_p5, 1, 0 }
  0x45   : > { %s1616_s24 = smul.u32 40, %s183_s20  ;;  %p2068_p11 = pnand %p1647_p7, %p37_p9 }
  0x46   : > { %s2075_s29 = scalar_lea.hbm %s2336_s0, %s1332_s28  ;;  %s2079_s6 = scalar_lea.sflag [#allocation3], %s183_s20 }
  0x47   : > { %s187_s30 = scalar_lea.vmem [#allocation2], %s1616_s24  ;;  %s1798_s25 = scalar_lea.hbm %s2075_s29, 640 }
  0x48   : > { %s194_s5 = sshll.u32 %s187_s30, 4  ;;  %p1799_p12 = scmp.ne.s32.totalorder %s2075_s29, %s1798_s25  ;;  %s2077_s5 = int_to_ptr.vmem [resolvable:$true] %s194_s5 }
  0x49   : > { %p1800_p0 = pneg %p2068_p11  ;;  %s1803_s26 = scalar_lea.hbm %s2336_s0, 1280 }
  0x4a   : > { %p1804_p13 = scmp.lt.u32.totalorder %s2075_s29, %s2336_s0  ;;  %p1805_p6 = scmp.lt.u32.totalorder %s1803_s26, %s1798_s25 }
  0x4b   : > { %p1801_p2 = pnand %p1800_p0, %p1799_p12  ;;  %p1807_p3 = scmp.lt.u32.totalorder %s1798_s25, %s2075_s29 }
  0x4c   : > { %p1806_p10 = por %p1805_p6, %p1804_p13 }
  0x4d   : > { %p1802_p1 = pneg %p1801_p2 }
  0x4e   : > { %p1808_p7 = por %p1807_p3, %p1806_p10 }
  0x50   : > { %p1809_p9 = pnand %p1808_p7, %p1802_p1 }
  0x52   : > { %1812 = shalt.err (!%p1809_p9)
}
  0x53   : > { %s1813_s20 = scalar_lea.vmem %s2077_s5, 640  ;;  %s1904_s24 = smov [#allocation2]  }
  0x54   : > { %p1814_p12 = scmp.ne.s32.totalorder %s2077_s5, %s1813_s20  ;;  %s1818_s12 = sshll.u32 %s1904_s24, 4  ;;  %s1819_s12 = int_to_ptr.vmem [resolvable:$false] %s1818_s12 }
  0x55   : > { %s1820_s27 = scalar_lea.vmem %s1819_s12, 1280  ;;  %p1821_p4 = scmp.lt.s32.totalorder %s2077_s5, %s1819_s12 }
  0x56   : > { %p1816_p2 = pnand %p1814_p12, %p1800_p0  ;;  %p1822_p13 = scmp.lt.s32.totalorder %s1820_s27, %s1813_s20 }
  0x58   : > { %p1817_p5 = pneg %p1816_p2  ;;  %p1823_p6 = por %p1822_p13, %p1821_p4 }
  0x5a   : > { %p1824_p10 = pnand %p1823_p6, %p1817_p5 }
  0x5c   : > { %1827 = shalt.err (!%p1824_p10)
}
  0x5d   : > { %s1905_s30 = smov 128   ;;  %s1906_s25 = smov 8  }
  0x5e   : > { %1640 = dma.hbm_to_vmem [thread:$0]  (!%p2068_p11), %s2075_s29, 640, %s2077_s5, %s2079_s6, %s1905_s30, %s1905_s30, %s1906_s25  }
  0x5f   : > { %206 = sbr.rel (%p1978_p8) target bundleno = 754 (0x2f2), region = 36  ;;  %s2110_s7 = sand.u32 (!%p1978_p8), 1, %s1890_s16  }
  0x60   : > { %s1617_s8 = smul.u32 (!%p1978_p8), 40, %s2110_s7  ;;  %s209_s26 = scalar_lea.sflag (!%p1978_p8), [#allocation3], %s2110_s7 }
  0x61   : > { %p2351_p4 = scmp.ne.s32.totalorder (!%p1978_p8), %s2344_s21, 0 }
  0x62   : > { %s2114_s10 = scalar_lea.vmem (!%p1978_p8), [#allocation2], %s1617_s8 }
  0x66   : > { %1873 = dma.done.wait (%p2351_p4), %s209_s26, 640  }
  0x67   : > { %1875 = vsyncadd (%p2351_p4), %s209_s26, 4294966656  ;;  %p2352_p5 = scmp.eq.s32.totalorder %s1959_s19, 0 }
  0x69   : > { %1877 = dma.done.wait (%p2352_p5), [#allocation6], 6144   ;;  %p2353_p8 = pmov %p2352_p5 }
  0x6a   : > { %v1907_v0 = vmov 0.0   ;;  %vm1908_vm0 = vmmov 0   ;;  %v1694_v1 = vld [vmem:[#allocation5 + $0x40] sm:$0xff]   ;;  %v1695_v2 = vld [vmem:[#allocation5 + $0x48] sm:$0xff]   ;;  %v1696_v3 = vld [vmem:[#allocation5 + $0x50] sm:$0xff]   ;;  %v666_v57 = vlaneseq  ;;  %vm1008_vm6 = vcmask 1046528  }
  0x6b   : > { %1879 = vsyncadd (%p2353_p8), [#allocation6], 4294961152  ;;  %1400 = vmatprep.subr.bf16.mxu0 %v1907_v0  ;;  %1416 = vmatprep.mubr.msk.bf16.mxu0 %vm1908_vm0, %v1907_v0  ;;  %v1697_v4 = vld [vmem:[#allocation5 + $0x58] sm:$0xff]   ;;  %v1698_v5 = vld [vmem:[#allocation5 + $0x60] sm:$0xff]   ;;  %vm753_vm7 = vsmask.f32 7424 }
  0x6c   : > { %1484 = vmatprep.subr.bf16.mxu1 %v1907_v0  ;;  %1500 = vmatprep.mubr.msk.bf16.mxu1 %vm1908_vm0, %v1907_v0  ;;  %v1699_v6 = vld [vmem:[#allocation5 + $0x68] sm:$0xff]   ;;  %v1700_v7 = vld [vmem:[#allocation5 + $0x70] sm:$0xff]   ;;  %v1701_v8 = vld [vmem:[#allocation5 + $0x78] sm:$0xff]   ;;  %v667_v58 = vshrl.u32 %v666_v57, 7  ;;  %s1274_s24 = sshll.u32 %s2110_s7, 5  ;;  %s1333_s30 = sshll.u32 %s1959_s19, 9 }
  0x6d   : > { %1401 = vmatpush3.bf16.msra.mxu0 %v1694_v1  ;;  %v257_v9 = vld [vmem:[%s2114_s10 + $0x1] sm:$0xff]  ;;  %v258_v10 = vld [vmem:[%s2114_s10 + $0x9] sm:$0xff]  ;;  %v259_v16 = vld [vmem:[%s2114_s10 + $0x11] sm:$0xff]  ;;  %s244_s12 = scalar_lea.vmem [#allocation8], %s1274_s24  ;;  %s2292_s26 = scalar_lea.hbm %s2340_s4, %s1333_s30 }
  0x6e   : > { %1402 = vmatprep.subr.bf16.mxu0 %v1907_v0  ;;  %v286_v11 = vpack.c.bf16 %v258_v10, %v257_v9  ;;  %v1718_v12 = vld [vmem:[#allocation7 + $0x40] sm:$0xff]   ;;  %v1719_v14 = vld [vmem:[#allocation7 + $0x48] sm:$0xff]   ;;  %v1704_v18 = vld [vmem:[#allocation5 + $0x10] sm:$0xff]   ;;  %vm672_vm1 = vcmp.eq.s32.totalorder %v667_v58, 0  ;;  %s1173_s27 = sshll.u32 %s244_s12, 4  ;;  %p2354_p0 = scmp.ne.s32.totalorder %s2349_s13, 0  ;;  %s2286_s27 = int_to_ptr.vmem [resolvable:$true] %s1173_s27 }
  0x6f   : > { %v1702_v13 = vld [vmem:[#allocation5] sm:$0xff]   ;;  %1485 = vmatpush3.bf16.msra.mxu1 %v1718_v12  ;;  %v1703_v15 = vld [vmem:[#allocation5 + $0x8] sm:$0xff]   ;;  %v1705_v20 = vld [vmem:[#allocation5 + $0x18] sm:$0xff]   ;;  %s1828_s21 = scalar_lea.vmem %s2286_s27, 512  ;;  %s1910_s19 = smov [#allocation8]  }
  0x70   : > { %v260_v17 = vld [vmem:[%s2114_s10 + $0x19] sm:$0xff]  ;;  %1486 = vmatprep.subr.bf16.mxu1 %v1907_v0  ;;  %v261_v21 = vld [vmem:[%s2114_s10 + $0x21] sm:$0x3f]  ;;  %v1706_v23 = vld [vmem:[#allocation5 + $0x20] sm:$0xff]   ;;  %p1829_p11 = scmp.ne.s32.totalorder %s2286_s27, %s1828_s21  ;;  %s1832_s23 = sshll.u32 %s1910_s19, 4  ;;  %s1833_s23 = int_to_ptr.vmem [resolvable:$false] %s1832_s23 }
  0x71   : > { %1403 = vmatpush3.bf16.msra.mxu0 %v1695_v2  ;;  %v287_v19 = vpack.c.bf16 %v260_v17, %v259_v16  ;;  %v288_v22 = vpack.c.bf16 %v261_v21, %v261_v21  ;;  %v1707_v24 = vld [vmem:[#allocation5 + $0x28] sm:$0xff]   ;;  %v1708_v25 = vld [vmem:[#allocation5 + $0x30] sm:$0xff]   ;;  %v1709_v26 = vld [vmem:[#allocation5 + $0x38] sm:$0xff]   ;;  %v669_v2 = vadd.s32 16, %v667_v58  ;;  %s1834_s11 = scalar_lea.vmem %s1833_s23, 1024  ;;  %p1835_p7 = scmp.lt.s32.totalorder %s2286_s27, %s1833_s23 }
  0x72   : > { %1404 = vmatprep.subr.bf16.mxu0 %v1907_v0  ;;  %v252_v27 = vld [vmem:[%s2114_s10] sm:$0xff]  ;;  %v253_v28 = vld [vmem:[%s2114_s10 + $0x8] sm:$0xff]  ;;  %v1711_v31 = vld [vmem:[#allocation5 + $0x88] sm:$0xff]   ;;  %p1830_p1 = pnand %p1829_p11, %p2354_p0  ;;  %p1836_p9 = scmp.lt.s32.totalorder %s1834_s11, %s1828_s21 }
  0x73   : > { %1487 = vmatpush3.bf16.msra.mxu1 %v1719_v14  ;;  %v267_v29 = vpack.c.bf16 %v253_v28, %v252_v27  ;;  %v1710_v30 = vld [vmem:[#allocation5 + $0x80] sm:$0xff]   ;;  %v255_v33 = vld [vmem:[%s2114_s10 + $0x18] sm:$0xff]  ;;  %v1713_v36 = vld [vmem:[#allocation5 + $0x98] sm:$0xff]   ;;  %vm679_vm2 = vcmp.eq.s32.totalorder %v669_v2, 17  ;;  %vm689_vm3 = vcmp.eq.s32.totalorder %v669_v2, 20 }
  0x74   : > { %1488 = vmatprep.subr.bf16.mxu1 %v1907_v0  ;;  %v254_v32 = vld [vmem:[%s2114_s10 + $0x10] sm:$0xff]  ;;  %v1712_v35 = vld [vmem:[#allocation5 + $0x90] sm:$0xff]   ;;  %v1717_v42 = vld [vmem:[#allocation5 + $0xb8] sm:$0xff]   ;;  %p1831_p3 = pneg %p1830_p1  ;;  %p1837_p12 = por %p1836_p9, %p1835_p7 }
  0x75   : > { %1405 = vmatpush3.bf16.msra.mxu0 %v1696_v3  ;;  %v268_v34 = vpack.c.bf16 %v255_v33, %v254_v32  ;;  %v256_v37 = vld [vmem:[%s2114_s10 + $0x20] sm:$0x3f]  ;;  %v1714_v39 = vld [vmem:[#allocation5 + $0xa0] sm:$0xff]   ;;  %v1715_v40 = vld [vmem:[#allocation5 + $0xa8] sm:$0xff]  }
  0x76   : > { %1406 = vmatprep.subr.bf16.mxu0 %v1907_v0  ;;  %v269_v38 = vpack.c.bf16 %v256_v37, %v256_v37  ;;  %v1716_v41 = vld [vmem:[#allocation5 + $0xb0] sm:$0xff]   ;;  %v2180_v44 = vld [vmem:[%s2114_s10 + $0xa] sm:$0xff]  ;;  %vm694_vm4 = vmor %vm679_vm2, %vm689_vm3  ;;  %p1838_p2 = pnand %p1837_p12, %p1831_p3 }
  0x77   : > { %v2177_v43 = vld [vmem:[%s2114_s10 + $0x2] sm:$0xff]  ;;  %v2188_v46 = vld [vmem:[%s2114_s10 + $0x12] sm:$0xff]  ;;  %v2191_v47 = vld [vmem:[%s2114_s10 + $0x1a] sm:$0xff] }
  0x78   : > { %v514_v45 = vpack.c.bf16 %v2180_v44, %v2177_v43  ;;  %v515_v48 = vpack.c.bf16 %v2191_v47, %v2188_v46  ;;  %v2198_v49 = vld [vmem:[%s2114_s10 + $0x22] sm:$0x3f]  ;;  %v1722_v53 = vld [vmem:[#allocation7 + $0x60] sm:$0xff]   ;;  %v1723_v54 = vld [vmem:[#allocation7 + $0x68] sm:$0xff]   ;;  %s1160_s10 = scalar_lea.sflag [#allocation4], %s2110_s7 }
  0x79   : > { %1407 = vmatpush3.bf16.msra.mxu0 %v1697_v4  ;;  %v516_v50 = vpack.c.bf16 %v2198_v49, %v2198_v49  ;;  %v1720_v51 = vld [vmem:[#allocation7 + $0x50] sm:$0xff]   ;;  %v1721_v52 = vld [vmem:[#allocation7 + $0x58] sm:$0xff]  }
  0x7a   : > { %1408 = vmatprep.subr.bf16.mxu0 %v1907_v0  ;;  %1489 = vmatpush3.bf16.msra.mxu1 %v1720_v51  ;;  %v1724_v55 = vld [vmem:[#allocation7 + $0x70] sm:$0xff]   ;;  %v1725_v56 = vld [vmem:[#allocation7 + $0x78] sm:$0xff]  }
  0x7b   : > { %1490 = vmatprep.subr.bf16.mxu1 %v1907_v0  ;;  %v1299_v59 = vld [vmem:[%s2339_s3] ss:$0 sm:$0xff]  ;;  %v1300_v60 = vld [vmem:[%s2339_s3 + $0x1] ss:$0 sm:$0xff] }
  0x7d   : > { %1409 = vmatpush3.bf16.msra.mxu0 %v1698_v5 }
  0x7e   : > { %1410 = vmatprep.subr.bf16.mxu0 %v1907_v0  ;;  %1491 = vmatpush3.bf16.msra.mxu1 %v1721_v52 }
  0x7f   : > { %1492 = vmatprep.subr.bf16.mxu1 %v1907_v0 }
  0x81   : > { %1411 = vmatpush3.bf16.msra.mxu0 %v1699_v6  ;;  %v1909_v6 = vmov 1.0  }
  0x82   : > { %1412 = vmatprep.subr.bf16.mxu0 %v1907_v0  ;;  %1493 = vmatpush3.bf16.msra.mxu1 %v1722_v53  ;;  %v1727_v53 = vld [vmem:[#allocation7 + $0x8] sm:$0xff]  }
  0x83   : > { %1494 = vmatprep.subr.bf16.mxu1 %v1907_v0 }
  0x85   : > { %1413 = vmatpush3.bf16.msra.mxu0 %v1700_v7  ;;  %v707_v7 = vsel %vm672_vm1, 0.0, %v1909_v6 }
  0x86   : > { %1414 = vmatprep.subr.bf16.mxu0 %v1907_v0  ;;  %1495 = vmatpush3.bf16.msra.mxu1 %v1723_v54 }
  0x87   : > { %1496 = vmatprep.subr.bf16.mxu1 %v1907_v0 }
  0x89   : > { %1415 = vmatpush3.bf16.msra.mxu0 %v1701_v8 }
  0x8a   : > { %1428 = vmatprep.subr.bf16.mxu0 %v1907_v0  ;;  %1497 = vmatpush3.bf16.msra.mxu1 %v1724_v55 }
  0x8b   : > { %1498 = vmatprep.subr.bf16.mxu1 %v1907_v0 }
  0x8c   : > { %1417 = vmatmul.mubr.bf16.vlgmr.msra.gmra.mrb[0].mxu0 %v286_v11 }
  0x8d   : > { %1429 = vmatpush3.bf16.msra.mxu0 %v1702_v13  ;;  %1420 = vmatprep.mubr.msk.bf16.mxu0 %vm1908_vm0, %v1907_v0 }
  0x8e   : > { %1430 = vmatprep.subr.bf16.mxu0 %v1907_v0  ;;  %1499 = vmatpush3.bf16.msra.mxu1 %v1725_v56 }
  0x8f   : > { %1512 = vmatprep.subr.bf16.mxu1 %v1907_v0 }
  0x91   : > { %1431 = vmatpush3.bf16.msra.mxu0 %v1703_v15 }
  0x92   : > { %1432 = vmatprep.subr.bf16.mxu0 %v1907_v0 }
  0x94   : > { %1421 = vmatmul.mubr.bf16.gmra.mrb[4].mxu0 %v287_v19 }
  0x95   : > { %1433 = vmatpush3.bf16.msra.mxu0 %v1704_v18  ;;  %1424 = vmatprep.mubr.msk.bf16.mxu0 %vm1908_vm0, %v1907_v0 }
  0x96   : > { %1434 = vmatprep.subr.bf16.mxu0 %v1907_v0 }
  0x99   : > { %1435 = vmatpush3.bf16.msra.mxu0 %v1705_v20  ;;  %v709_v20 = vsel %vm694_vm4, 0.0, %v1909_v6 }
  0x9a   : > { %1436 = vmatprep.subr.bf16.mxu0 %v1907_v0 }
  0x9c   : > { %1425 = vmatmul.mubr.bf16.gmra.mrb[8].mxu0 %v288_v22 }
  0x9d   : > { %1437 = vmatpush3.bf16.msra.mxu0 %v1706_v23  ;;  %1444 = vmatprep.mubr.msk.bf16.mxu0 %vm1908_vm0, %v1907_v0  ;;  %v671_v23 = vadd.s32 32, %v667_v58 }
  0x9e   : > { %1438 = vmatprep.subr.bf16.mxu0 %v1907_v0 }
  0x9f   : > { %vm701_vm5 = vcmp.eq.s32.totalorder %v671_v23, 37 }
  0xa1   : > { %1439 = vmatpush3.bf16.msra.mxu0 %v1707_v24 }
  0xa2   : > { %1440 = vmatprep.subr.bf16.mxu0 %v1907_v0 }
  0xa5   : > { %1441 = vmatpush3.bf16.msra.mxu0 %v1708_v25 }
  0xa6   : > { %1442 = vmatprep.subr.bf16.mxu0 %v1907_v0 }
  0xa9   : > { %1443 = vmatpush3.bf16.msra.mxu0 %v1709_v26 }
  0xaa   : > { %1456 = vmatprep.subr.bf16.mxu0 %v1907_v0 }
  0xac   : > { %1445 = vmatmul.mubr.bf16.vlgmr.msra.gmra.mrb[0].mxu0 %v267_v29 }
  0xad   : > { %1457 = vmatpush3.bf16.msra.mxu0 %v1710_v30  ;;  %1448 = vmatprep.mubr.msk.bf16.mxu0 %vm1908_vm0, %v1907_v0 }
  0xae   : > { %1458 = vmatprep.subr.bf16.mxu0 %v1907_v0 }
  0xb1   : > { %1459 = vmatpush3.bf16.msra.mxu0 %v1711_v31 }
  0xb2   : > { %1460 = vmatprep.subr.bf16.mxu0 %v1907_v0 }
  0xb4   : > { %1449 = vmatmul.mubr.bf16.gmra.mrb[4].mxu0 %v268_v34 }
  0xb5   : > { %1461 = vmatpush3.bf16.msra.mxu0 %v1712_v35  ;;  %1452 = vmatprep.mubr.msk.bf16.mxu0 %vm1908_vm0, %v1907_v0 }
  0xb6   : > { %1462 = vmatprep.subr.bf16.mxu0 %v1907_v0 }
  0xb9   : > { %1463 = vmatpush3.bf16.msra.mxu0 %v1713_v36 }
  0xba   : > { %1464 = vmatprep.subr.bf16.mxu0 %v1907_v0 }
  0xbc   : > { %1453 = vmatmul.mubr.bf16.gmra.mrb[8].mxu0 %v269_v38 }
  0xbd   : > { %1465 = vmatpush3.bf16.msra.mxu0 %v1714_v39  ;;  %1472 = vmatprep.mubr.msk.bf16.mxu0 %vm1908_vm0, %v1907_v0  ;;  %v711_v39 = vsel %vm701_vm5, 0.0, %v1909_v6  ;;  %v1734_v6 = vld [vmem:[#allocation7 + $0x80] sm:$0xff]  }
  0xbe   : > { %1466 = vmatprep.subr.bf16.mxu0 %v1907_v0 }
  0xc1   : > { %1467 = vmatpush3.bf16.msra.mxu0 %v1715_v40 }
  0xc2   : > { %1468 = vmatprep.subr.bf16.mxu0 %v1907_v0 }
  0xc5   : > { %1469 = vmatpush3.bf16.msra.mxu0 %v1716_v41 }
  0xc6   : > { %1470 = vmatprep.subr.bf16.mxu0 %v1907_v0 }
  0xc9   : > { %1471 = vmatpush3.bf16.msra.mxu0 %v1717_v42 }
  0xcc   : > { %1473 = vmatmul.mubr.bf16.vlgmr.msra.gmra.mrb[0].mxu0 %v514_v45  ;;  %v1726_v45 = vld [vmem:[#allocation7] sm:$0xff]  }
  0xcd   : > { %1476 = vmatprep.mubr.msk.bf16.mxu0 %vm1908_vm0, %v1907_v0 }
  0xd4   : > { %1477 = vmatmul.mubr.bf16.gmra.mrb[4].mxu0 %v515_v48 }
  0xd5   : > { %1480 = vmatprep.mubr.msk.bf16.mxu0 %vm1908_vm0, %v1907_v0 }
  0xdc   : > { %1481 = vmatmul.mubr.bf16.gmra.mrb[8].mxu0 %v516_v50 }
 0x19f   : > { %v616_v61 = vpop.f32.mrb[0].mxu0 }
 0x1a0   : > { %v647_v62 = vmul.f32 %v1299_v59, %v616_v61  ;;  %v1474_v63 = vpop.f32.mrb[1].mxu0 }
 0x1a1   : > { %v619_v1 = vpop.f32.mrb[2].mxu0 }
 0x1a2   : > { %v656_v3 = vadd.f32 %v1300_v60, %v647_v62  ;;  %v648_v4 = vmul.f32 %v1299_v59, %v619_v1  ;;  %v1475_v5 = vpop.f32.mrb[3].mxu0  ;;  %v1729_v62 = vld [vmem:[#allocation7 + $0x18] sm:$0xff]   ;;  %v1730_v1 = vld [vmem:[#allocation7 + $0x20] sm:$0xff]  }
 0x1a3   : > { %v1733_v5 = vld [vmem:[#allocation7 + $0x38] sm:$0xff]  }
 0x1a4   : > { %v661_v8 = vmax.f32 %v656_v3, 0.0  ;;  %v657_v9 = vadd.f32 %v1300_v60, %v648_v4  ;;  %v1731_v3 = vld [vmem:[#allocation7 + $0x28] sm:$0xff]   ;;  %v1732_v4 = vld [vmem:[#allocation7 + $0x30] sm:$0xff]  }
 0x1a6   : > { %v712_v10 = vmul.f32 %v707_v7, %v661_v8  ;;  %v662_v11 = vmax.f32 %v657_v9, 0.0  ;;  %v1735_v7 = vld [vmem:[#allocation7 + $0x88] sm:$0xff]   ;;  %v1736_v8 = vld [vmem:[#allocation7 + $0x90] sm:$0xff]   ;;  %v1737_v9 = vld [vmem:[#allocation7 + $0x98] sm:$0xff]  }
 0x1a7   : > { %v624_v12 = vpop.f32.mrb[4].mxu0 }
 0x1a8   : > { %v2214_v13 = vpack.c.bf16 %v662_v11, %v712_v10  ;;  %v649_v14 = vmul.f32 %v1299_v59, %v624_v12  ;;  %v1478_v15 = vpop.f32.mrb[5].mxu0  ;;  %v1738_v10 = vld [vmem:[#allocation7 + $0xa0] sm:$0xff]   ;;  %v1739_v11 = vld [vmem:[#allocation7 + $0xa8] sm:$0xff]   ;;  %v1740_v12 = vld [vmem:[#allocation7 + $0xb0] sm:$0xff]  }
 0x1a9   : > { %v627_v16 = vpop.f32.mrb[6].mxu0  ;;  %v1326_v15 = vld [vmem:[%s2339_s3 + $0x3] ss:$0 sm:$0xff] }
 0x1aa   : > { %v658_v17 = vadd.f32 %v1300_v60, %v649_v14  ;;  %v650_v18 = vmul.f32 %v1299_v59, %v627_v16  ;;  %v1479_v19 = vpop.f32.mrb[7].mxu0  ;;  %v757_v24 = vshll.u32 %v2214_v13, 16  ;;  %v755_v33 = vshrl.u32 %v2214_v13, 16  ;;  %v1325_v14 = vld [vmem:[%s2339_s3 + $0x2] ss:$0 sm:$0xff] }
 0x1ab   : > { %v1009_v37 = vrot.slane %v2214_v13, 1 }
 0x1ac   : > { %v663_v21 = vmax.f32 %v658_v17, 0.0  ;;  %v659_v22 = vadd.f32 %v1300_v60, %v650_v18  ;;  %v759_v31 = vrot.slane %v757_v24, 1 }
 0x1ae   : > { %v714_v25 = vmul.f32 %v709_v20, %v663_v21  ;;  %v664_v26 = vmax.f32 %v659_v22, 0.0  ;;  %v760_v41 = vor.u32 %v759_v31, %v755_v33 }
 0x1af   : > { %v632_v27 = vpop.f32.mrb[8].mxu0 }
 0x1b0   : > { %v2217_v28 = vpack.c.bf16 %v664_v26, %v714_v25  ;;  %v651_v29 = vmul.f32 %v1299_v59, %v632_v27  ;;  %v1482_v30 = vpop.f32.mrb[9].mxu0  ;;  %v1728_v59 = vld [vmem:[#allocation7 + $0x10] sm:$0xff]  }
 0x1b1   : > { %v635_v32 = vpop.f32.mrb[10].mxu0 }
 0x1b2   : > { %v660_v34 = vadd.f32 %v1300_v60, %v651_v29  ;;  %v1483_v35 = vpop.f32.mrb[11].mxu0  ;;  %v762_v36 = vshll.u32 %v2217_v28, 16  ;;  %v1010_v38 = vrot.slane %v2217_v28, 1  ;;  %v766_v54 = vshrl.u32 %v2217_v28, 16 }
 0x1b4   : > { %v665_v40 = vmax.f32 %v660_v34, 0.0  ;;  %v764_v42 = vrot.slane %v762_v36, 1  ;;  %v2224_v48 = vsel %vm1008_vm6, %v1009_v37, %v1010_v38 }
 0x1b6   : > { %v716_v50 = vmul.f32 %v711_v39, %v665_v40  ;;  %v765_v51 = vsel %vm753_vm7, %v760_v41, %v764_v42  ;;  %v768_v57 = vor.u32 %v766_v54, %v764_v42 }
 0x1b7   : > { %1501 = vmatmul.mubr.bf16.vlgmr.msra.gmra.mrb[0].mxu1 %v765_v51 }
 0x1b8   : > { %v2227_v52 = vpack.c.bf16 %v716_v50, %v716_v50  ;;  %1513 = vmatpush3.bf16.msra.mxu1 %v1726_v45  ;;  %1504 = vmatprep.mubr.msk.bf16.mxu1 %vm1908_vm0, %v1907_v0 }
 0x1b9   : > { %1514 = vmatprep.subr.bf16.mxu1 %v1907_v0 }
 0x1ba   : > { %v770_v55 = vshll.u32 %v2227_v52, 16  ;;  %v1012_v56 = vrot.slane %v2227_v52, 1  ;;  %v774_v63 = vshrl.u32 %v2227_v52, 16 }
 0x1bc   : > { %1515 = vmatpush3.bf16.msra.mxu1 %v1727_v53  ;;  %v772_v58 = vrot.slane %v770_v55, 1  ;;  %v1013_v60 = vsel %vm1008_vm6, %v1010_v38, %v1012_v56 }
 0x1bd   : > { %1516 = vmatprep.subr.bf16.mxu1 %v1907_v0 }
 0x1be   : > { %v773_v61 = vsel %vm753_vm7, %v768_v57, %v772_v58  ;;  %v776_v2 = vor.u32 %v774_v63, %v772_v58 }
 0x1bf   : > { %1505 = vmatmul.mubr.bf16.gmra.mrb[4].mxu1 %v773_v61 }
 0x1c0   : > { %1517 = vmatpush3.bf16.msra.mxu1 %v1728_v59  ;;  %1508 = vmatprep.mubr.msk.bf16.mxu1 %vm1908_vm0, %v1907_v0 }
 0x1c1   : > { %1518 = vmatprep.subr.bf16.mxu1 %v1907_v0 }
 0x1c4   : > { %1519 = vmatpush3.bf16.msra.mxu1 %v1729_v62 }
 0x1c5   : > { %1520 = vmatprep.subr.bf16.mxu1 %v1907_v0 }
 0x1c7   : > { %1509 = vmatmul.mubr.bf16.gmra.mrb[8].mxu1 %v776_v2 }
 0x1c8   : > { %1521 = vmatpush3.bf16.msra.mxu1 %v1730_v1  ;;  %1528 = vmatprep.mubr.msk.bf16.mxu1 %vm1908_vm0, %v1907_v0 }
 0x1c9   : > { %1522 = vmatprep.subr.bf16.mxu1 %v1907_v0 }
 0x1cc   : > { %1523 = vmatpush3.bf16.msra.mxu1 %v1731_v3 }
 0x1cd   : > { %1524 = vmatprep.subr.bf16.mxu1 %v1907_v0 }
 0x1d0   : > { %1525 = vmatpush3.bf16.msra.mxu1 %v1732_v4 }
 0x1d1   : > { %1526 = vmatprep.subr.bf16.mxu1 %v1907_v0 }
 0x1d4   : > { %1527 = vmatpush3.bf16.msra.mxu1 %v1733_v5 }
 0x1d5   : > { %1540 = vmatprep.subr.bf16.mxu1 %v1907_v0 }
 0x1d7   : > { %1529 = vmatmul.mubr.bf16.vlgmr.msra.gmra.mrb[0].mxu1 %v2214_v13  ;;  %v1741_v13 = vld [vmem:[#allocation7 + $0xb8] sm:$0xff]  }
 0x1d8   : > { %1541 = vmatpush3.bf16.msra.mxu1 %v1734_v6  ;;  %1532 = vmatprep.mubr.msk.bf16.mxu1 %vm1908_vm0, %v1907_v0 }
 0x1d9   : > { %1542 = vmatprep.subr.bf16.mxu1 %v1907_v0 }
 0x1dc   : > { %1543 = vmatpush3.bf16.msra.mxu1 %v1735_v7 }
 0x1dd   : > { %1544 = vmatprep.subr.bf16.mxu1 %v1907_v0 }
 0x1df   : > { %1533 = vmatmul.mubr.bf16.gmra.mrb[4].mxu1 %v2217_v28 }
 0x1e0   : > { %1545 = vmatpush3.bf16.msra.mxu1 %v1736_v8  ;;  %1536 = vmatprep.mubr.msk.bf16.mxu1 %vm1908_vm0, %v1907_v0 }
 0x1e1   : > { %1546 = vmatprep.subr.bf16.mxu1 %v1907_v0 }
 0x1e4   : > { %1547 = vmatpush3.bf16.msra.mxu1 %v1737_v9 }
 0x1e5   : > { %1548 = vmatprep.subr.bf16.mxu1 %v1907_v0 }
 0x1e7   : > { %1537 = vmatmul.mubr.bf16.gmra.mrb[8].mxu1 %v2227_v52 }
 0x1e8   : > { %1549 = vmatpush3.bf16.msra.mxu1 %v1738_v10  ;;  %1556 = vmatprep.mubr.msk.bf16.mxu1 %vm1908_vm0, %v1907_v0 }
 0x1e9   : > { %1550 = vmatprep.subr.bf16.mxu1 %v1907_v0 }
 0x1ec   : > { %1551 = vmatpush3.bf16.msra.mxu1 %v1739_v11 }
 0x1ed   : > { %1552 = vmatprep.subr.bf16.mxu1 %v1907_v0 }
 0x1f0   : > { %1553 = vmatpush3.bf16.msra.mxu1 %v1740_v12 }
 0x1f1   : > { %1554 = vmatprep.subr.bf16.mxu1 %v1907_v0 }
 0x1f4   : > { %1555 = vmatpush3.bf16.msra.mxu1 %v1741_v13 }
 0x1f7   : > { %1557 = vmatmul.mubr.bf16.vlgmr.msra.gmra.mrb[0].mxu1 %v2224_v48 }
 0x1f8   : > { %1560 = vmatprep.mubr.msk.bf16.mxu1 %vm1908_vm0, %v1907_v0 }
 0x1ff   : > { %1561 = vmatmul.mubr.bf16.gmra.mrb[4].mxu1 %v1013_v60 }
 0x200   : > { %1564 = vmatprep.mubr.msk.bf16.mxu1 %vm1908_vm0, %v1907_v0 }
 0x207   : > { %1565 = vmatmul.mubr.bf16.gmra.mrb[8].mxu1 %v1012_v56 }
 0x2ca   : > { %v1099_v16 = vpop.f32.mrb[0].mxu1 }
 0x2cb   : > { %v1130_v17 = vmul.f32 %v1325_v14, %v1099_v16  ;;  %v1558_v18 = vpop.f32.mrb[1].mxu1 }
 0x2cc   : > { %v1102_v19 = vpop.f32.mrb[2].mxu1 }
 0x2cd   : > { %v1139_v20 = vadd.f32 %v1326_v15, %v1130_v17  ;;  %v1131_v21 = vmul.f32 %v1325_v14, %v1102_v19  ;;  %v1559_v22 = vpop.f32.mrb[3].mxu1 }
 0x2cf   : > { %v1144_v0 = vadd.f32 %v1139_v20, %v2177_v43  ;;  %v1140_v23 = vadd.f32 %v1326_v15, %v1131_v21 }
 0x2d1   : > { %v1149_v24 = vmax.f32 %v1144_v0, 0.0  ;;  %v1145_v25 = vadd.f32 %v1140_v23, %v2180_v44 }
 0x2d2   : > { %v1107_v26 = vpop.f32.mrb[4].mxu1 }
 0x2d3   : > { %1154 = vst [vmem:[%s244_s12] sm:$0xff] %v1149_v24  ;;  %v1150_v27 = vmax.f32 %v1145_v25, 0.0  ;;  %v1132_v28 = vmul.f32 %v1325_v14, %v1107_v26  ;;  %v1562_v29 = vpop.f32.mrb[5].mxu1 }
 0x2d4   : > { %v1110_v30 = vpop.f32.mrb[6].mxu1 }
 0x2d5   : > { %1155 = vst [vmem:[%s244_s12 + $0x8] sm:$0xff] %v1150_v27  ;;  %v1141_v31 = vadd.f32 %v1326_v15, %v1132_v28  ;;  %v1133_v32 = vmul.f32 %v1325_v14, %v1110_v30  ;;  %v1563_v33 = vpop.f32.mrb[7].mxu1 }
 0x2d7   : > { %v1146_v34 = vadd.f32 %v1141_v31, %v2188_v46  ;;  %v1142_v35 = vadd.f32 %v1326_v15, %v1133_v32 }
 0x2d9   : > { %v1151_v43 = vmax.f32 %v1146_v34, 0.0  ;;  %v1147_v36 = vadd.f32 %v1142_v35, %v2191_v47 }
 0x2da   : > { %v1115_v37 = vpop.f32.mrb[8].mxu1 }
 0x2db   : > { %1156 = vst [vmem:[%s244_s12 + $0xc] sm:$0xf0] %v1151_v43  ;;  %v1152_v44 = vmax.f32 %v1147_v36, 0.0  ;;  %v1134_v38 = vmul.f32 %v1325_v14, %v1115_v37  ;;  %v1566_v39 = vpop.f32.mrb[9].mxu1 }
 0x2dc   : > { %v1118_v40 = vpop.f32.mrb[10].mxu1 }
 0x2dd   : > { %1157 = vst [vmem:[%s244_s12 + $0x14] sm:$0xff] %v1152_v44  ;;  %v1143_v41 = vadd.f32 %v1326_v15, %v1134_v38  ;;  %v1567_v42 = vpop.f32.mrb[11].mxu1 }
 0x2df   : > { %v1148_v46 = vadd.f32 %v1143_v41, %v2198_v49 }
 0x2e1   : > { %v1153_v47 = vmax.f32 %v1148_v46, 0.0 }
 0x2e3   : > { %1158 = vst [vmem:[%s244_s12 + $0x1c] sm:$0xf] %v1153_v47 }
 0x2e4   : > { %1841 = shalt.err (!%p1838_p2)
}
 0x2e5   : > { %s1842_s29 = scalar_lea.hbm %s2292_s26, 512  ;;  %s1846_s28 = scalar_lea.hbm %s2340_s4, 1024 }
 0x2e6   : > { %p1843_p13 = scmp.ne.s32.totalorder %s2292_s26, %s1842_s29  ;;  %p1847_p4 = scmp.lt.u32.totalorder %s2292_s26, %s2340_s4 }
 0x2e7   : > { %p1848_p5 = scmp.lt.u32.totalorder %s1846_s28, %s1842_s29  ;;  %p1850_p11 = scmp.lt.u32.totalorder %s1842_s29, %s2292_s26 }
 0x2e8   : > { %p1844_p6 = pnand %p1843_p13, %p2354_p0 }
 0x2e9   : > { %p1849_p8 = por %p1848_p5, %p1847_p4 }
 0x2ea   : > { %p1845_p10 = pneg %p1844_p6 }
 0x2eb   : > { %p1851_p1 = por %p1850_p11, %p1849_p8 }
 0x2ed   : > { %p1852_p3 = pnand %p1851_p1, %p1845_p10 }
 0x2ef   : > { %1855 = shalt.err (!%p1852_p3)
}
 0x2f0   : > { %s1911_s12 = smov 128   ;;  %s1912_s30 = smov 8  }
 0x2f1   : > { %1628 = dma.vmem_to_hbm [thread:$0]  (%p2354_p0), %s2286_s27, 512, %s2292_s26, %s1160_s10, %s1911_s12, %s1911_s12, %s1912_s30  }
 0x2f2 PF: > { %s1188_s25 = sand.u32 1, %s1886_s15   ;;  %p2355_p7 = scmp.ne.s32.totalorder %s2345_s22, 0 }
 0x2f3   : > { %p2356_p9 = scmp.ge.s32.totalorder %s1898_s18, 2  ;;  %s1189_s8 = scalar_lea.sflag [#allocation4], %s1188_s25 }
 0x2f5   : > { %p1642_p12 = pnand %p2356_p9, %p2355_p7 }
 0x2f7   : > { %1881 = dma.done.wait (!%p1642_p12), %s1189_s8, 512  }
 0x2f8   : > { %1883 = vsyncadd (!%p1642_p12), %s1189_s8, 4294966784  ;;  %p18_p2 = scmp.ge.s32.totalorder %s2048_s9, 4   ;;  %s2357_s15 = smov %s1890_s16 }
 0x2f9   : > { %s2358_s16 = smov %s1894_s17  ;;  %s2359_s17 = smov %s2064_s14 }
 0x2fa   : > { %s2360_s18 = smov %s2048_s9  ;;  %20 = sbr.rel (!%p18_p2) target bundleno = 6 (0x6), region = 93 }
 0x301   :  { %1194 = vsyncpa [#allocation3], 1 }
 0x302   :  { %1196 = vsyncpa [#allocation3 + $0x1], 1 }
 0x303   :  { %1197 = vsyncpa [#allocation6], 1 }
 0x304   :  { %1198 = vsyncpa [#allocation4], 1 }
 0x305   :  { %1200 = vsyncpa [#allocation4 + $0x1], 1 }

</bundles_post_ra>
